<compile_context>
chip_gen: v6e
topology: v6e:2x2x1
jax: 0.10.0
libtpu: 0.0.40
codegen_flags: <defaults>
</compile_context>

<pallas_src>
import functools

import jax
import jax.numpy as jnp
from jax.experimental import pallas as pl
from jax.experimental.pallas import tpu as pltpu


def _mkrb_kernel(x_ref, w1_ref, b1_ref, w2_ref, b2_ref, o_ref,
                 buf_ref, patch_ref, *, H, W, C, K1, K2, margin):
    """One batch element, both branches fused.

    x_ref    : (C, H*W)             input, channel-major, flat spatial
    w1_ref   : (C, K1*K1*C)         conv1 weights (BN1 scale folded in)
    b1_ref   : (C, 1)               folded BN1 bias (includes conv bias)
    w2_ref   : (C, K2*K2*C)         conv2 weights (BN2 scale folded in)
    b2_ref   : (C, 1)               folded BN2 bias
    o_ref    : (C, H*W)             output
    buf_ref  : (C, H*W + 2*margin)  zero-margin staging buffer (VMEM scratch)
    patch_ref: (K2*K2*C, H*W)       im2col patch matrix (VMEM scratch)
    """
    HW = H * W

    # Zero the staging buffer once per grid step; only its interior is
    # rewritten per branch, the margins stay zero (H-direction "same" pad).
    buf_ref[...] = jnp.zeros_like(buf_ref)

    # Column-validity masks for the W-direction "same" padding, one per
    # horizontal tap offset (built once, shared by both branches).
    p2 = K2 // 2
    col = jax.lax.broadcasted_iota(jnp.int32, (1, HW), 1) % W
    wmask = {}
    for dw in range(-p2, p2 + 1):
        if dw != 0:
            valid = jnp.logical_and(col + dw >= 0, col + dw < W)
            wmask[dw] = valid.astype(jnp.float32)

    def conv_bn_relu(src, w_ref, b_ref, K):
        p = K // 2
        # Stage src into the middle of the zero-margin buffer (lane-aligned).
        buf_ref[:, margin:margin + HW] = src
        # Build the im2col patch matrix: one shifted (masked) window per tap.
        for kh in range(K):
            for kw in range(K):
                dh, dw = kh - p, kw - p
                start = margin + dh * W + dw            # static offset
                win = buf_ref[:, start:start + HW]      # (C, HW)
                if dw != 0:
                    win = win * wmask[dw]               # mask W-direction wrap
                t = kh * K + kw
                patch_ref[t * C:(t + 1) * C, :] = win
        rows = K * K * C
        # Single MXU matmul: (C, K*K*C) @ (K*K*C, HW) -> (C, HW), lane-dense.
        y = jnp.dot(w_ref[...], patch_ref[:rows, :],
                    preferred_element_type=jnp.float32)
        y = y + b_ref[...]                              # folded BN bias
        return jnp.maximum(y, 0.0)                      # ReLU

    x = x_ref[...].astype(jnp.float32)
    y0 = conv_bn_relu(x, w1_ref, b1_ref, K1)            # branch 1 (3x3)
    fused = y0 + x                                      # residual = input tile
    y1 = conv_bn_relu(fused, w2_ref, b2_ref, K2)        # branch 2 (5x5)
    o_ref[...] = (y1 + fused).astype(o_ref.dtype)


def mkrb_forward(x_nchw, params):
    """Fused MKRB forward. x is NCHW; output is NCHW."""
    N, C, H, W = x_nchw.shape
    HW = H * W
    K1, K2 = 3, 5
    # Margin must cover the largest tap shift (p2*W + p2); round up to a
    # multiple of 128 so the interior staging store stays lane-aligned.
    need = (K2 // 2) * W + (K2 // 2)
    margin = ((need + 127) // 128) * 128

    x_cm = x_nchw.reshape(N, C, HW)      # free reshape, no transpose

    out = pl.pallas_call(
        functools.partial(_mkrb_kernel, H=H, W=W, C=C, K1=K1, K2=K2,
                          margin=margin),
        out_shape=jax.ShapeDtypeStruct((N, C, HW), x_nchw.dtype),
        grid=(N,),
        in_specs=[
            pl.BlockSpec((None, C, HW), lambda n: (n, 0, 0)),
            pl.BlockSpec((C, K1 * K1 * C), lambda n: (0, 0)),
            pl.BlockSpec((C, 1), lambda n: (0, 0)),
            pl.BlockSpec((C, K2 * K2 * C), lambda n: (0, 0)),
            pl.BlockSpec((C, 1), lambda n: (0, 0)),
        ],
        out_specs=pl.BlockSpec((None, C, HW), lambda n: (n, 0, 0)),
        scratch_shapes=[
            pltpu.VMEM((C, HW + 2 * margin), jnp.float32),
            pltpu.VMEM((K2 * K2 * C, HW), jnp.float32),
        ],
        compiler_params=pltpu.CompilerParams(
            dimension_semantics=("parallel",)),
    )(x_cm, params["w1s"], params["b1f"], params["w2s"], params["b2f"])

    return out.reshape(N, C, H, W)


def fold_bn(conv_bias, gamma, beta, running_mean, running_var, eps=1e-5):
    """Fold eval-mode BatchNorm (and conv bias) into per-channel scale/bias."""
    scale = gamma / jnp.sqrt(running_var + eps)
    bias = scale * (conv_bias - running_mean) + beta
    return scale, bias


def prepare_branch(w_oihw, conv_bias, gamma, beta, rmean, rvar):
    """Fold BN into a (Cout, K*K*Cin) weight matrix and a (Cout, 1) bias."""
    Cout, Cin, K, _ = w_oihw.shape
    scale, bias = fold_bn(conv_bias, gamma, beta, rmean, rvar)
    # Row ordering must match the kernel's patch rows: (kh*K + kw)*Cin + cin.
    w_mat = jnp.transpose(w_oihw, (0, 2, 3, 1)).reshape(Cout, K * K * Cin)
    w_scaled = w_mat * scale[:, None]       # fold BN scale into the weights
    return w_scaled, bias.reshape(Cout, 1), scale, bias


def init_params(key, channels):
    ks = jax.random.split(key, 12)

    def raw(kw, kb, kg, kbe, km, kv, ksize):
        w = jax.random.normal(kw, (channels, channels, ksize, ksize),
                              jnp.float32) * 0.1                    # OIHW
        b = jax.random.normal(kb, (channels,), jnp.float32) * 0.1
        gamma = 1.0 + 0.1 * jax.random.normal(kg, (channels,), jnp.float32)
        beta = 0.1 * jax.random.normal(kbe, (channels,), jnp.float32)
        rmean = 0.1 * jax.random.normal(km, (channels,), jnp.float32)
        rvar = jax.random.uniform(kv, (channels,), jnp.float32,
                                  minval=0.5, maxval=1.5)
        return w, b, gamma, beta, rmean, rvar

    w1, cb1, g1, be1, m1, v1 = raw(*ks[0:6], 3)
    w2, cb2, g2, be2, m2, v2 = raw(*ks[6:12], 5)
    w1s, b1f, s1, b1 = prepare_branch(w1, cb1, g1, be1, m1, v1)
    w2s, b2f, s2, b2 = prepare_branch(w2, cb2, g2, be2, m2, v2)
    return dict(w1_oihw=w1, s1=s1, b1=b1, w1s=w1s, b1f=b1f,
                w2_oihw=w2, s2=s2, b2=b2, w2s=w2s, b2f=b2f)


def mkrb_reference(x_nchw, params):
    """Pure-JAX reference (lax conv, eval-mode BN) for correctness checking."""
    def branch(x, w_oihw, scale, bias, pad):
        y = jax.lax.conv_general_dilated(
            x, w_oihw, window_strides=(1, 1), padding=[(pad, pad), (pad, pad)],
            dimension_numbers=("NCHW", "OIHW", "NCHW"))
        y = y * scale[None, :, None, None] + bias[None, :, None, None]
        return jnp.maximum(y, 0.0)

    y0 = branch(x_nchw, params["w1_oihw"], params["s1"], params["b1"], 1)
    fused = y0 + x_nchw
    y1 = branch(fused, params["w2_oihw"], params["s2"], params["b2"], 2)
    return y1 + fused


if __name__ == "__main__":
    key = jax.random.PRNGKey(0)
    k_x, k_p = jax.random.split(key)

    N, C, H, W = 2, 4, 16, 16      # residual add requires in_ch == out_ch
    x = jax.random.normal(k_x, (N, C, H, W), jnp.float32)
    params = init_params(k_p, C)

    out = jax.block_until_ready(mkrb_forward(x, params))

    ref = mkrb_reference(x, params)
    assert out.shape == (N, C, H, W)
    assert jnp.allclose(out, ref, rtol=1e-4, atol=1e-4), "mismatch vs reference"

    print("KERNEL_OK")
</pallas_src>

<mosaic_0001>
module attributes {stable_mosaic.version = 11 : i64} {
  func.func @_mkrb_kernel(%arg0: i32, %arg1: memref<1x4x256xf32, #tpu.memory_space<vmem>>, %arg2: memref<4x36xf32, #tpu.memory_space<vmem>>, %arg3: memref<4x1xf32, #tpu.memory_space<vmem>>, %arg4: memref<4x100xf32, #tpu.memory_space<vmem>>, %arg5: memref<4x1xf32, #tpu.memory_space<vmem>>, %arg6: memref<1x4x256xf32, #tpu.memory_space<vmem>>, %arg7: memref<4x512xf32, #tpu.memory_space<vmem>>, %arg8: memref<100x256xf32, #tpu.memory_space<vmem>>) attributes {dimension_semantics = [#tpu.dimension_semantics<parallel>], iteration_bounds = array<i64: 2>, scalar_prefetch = 0 : i64, scratch_operands = 2 : i64, tpu.core_type = #tpu.core_type<tc>, window_params = [{transform_indices = @transform_0, window_bounds = array<i64: 1, 4, 256>}, {pipeline_mode = #tpu.pipeline_mode<synchronous>, transform_indices = @transform_1, window_bounds = array<i64: 4, 36>}, {pipeline_mode = #tpu.pipeline_mode<synchronous>, transform_indices = @transform_2, window_bounds = array<i64: 4, 1>}, {pipeline_mode = #tpu.pipeline_mode<synchronous>, transform_indices = @transform_3, window_bounds = array<i64: 4, 100>}, {pipeline_mode = #tpu.pipeline_mode<synchronous>, transform_indices = @transform_4, window_bounds = array<i64: 4, 1>}, {transform_indices = @transform_5, window_bounds = array<i64: 1, 4, 256>}]} {
    %cst = arith.constant 0.000000e+00 : f32
    %0 = vector.broadcast %cst : f32 to vector<4x512xf32>
    %c0 = arith.constant 0 : index
    %c0_0 = arith.constant 0 : index
    %1 = vector.load %arg7[%c0, %c0_0] : memref<4x512xf32, #tpu.memory_space<vmem>>, vector<4x512xf32>
    tpu.vector_store %arg7[%c0, %c0_0], %0 {strides = array<i32>} : memref<4x512xf32, #tpu.memory_space<vmem>>, vector<4x512xf32>,
    %2 = tpu.iota {dimensions = array<i32: 1>} : vector<1x256xi32>
    %c16_i32 = arith.constant 16 : i32
    %c0_i32 = arith.constant 0 : i32
    %3 = arith.cmpi eq, %c16_i32, %c0_i32 : i32
    %c1_i32 = arith.constant 1 : i32
    %4 = arith.select %3, %c1_i32, %c16_i32 : i32
    %5 = vector.broadcast %4 : i32 to vector<1x256xi32>
    %6 = arith.remsi %2, %5 : vector<1x256xi32>
    %c0_i32_1 = arith.constant 0 : i32
    %7 = vector.broadcast %c0_i32_1 : i32 to vector<1x256xi32>
    %8 = arith.cmpi ne, %6, %7 : vector<1x256xi32>
    %c0_i32_2 = arith.constant 0 : i32
    %9 = vector.broadcast %c0_i32_2 : i32 to vector<1x256xi32>
    %10 = arith.cmpi slt, %6, %9 : vector<1x256xi32>
    %c0_i32_3 = arith.constant 0 : i32
    %11 = arith.cmpi slt, %4, %c0_i32_3 : i32
    %12 = vector.broadcast %11 : i1 to vector<1x256xi1>
    %13 = vector.broadcast %12 : vector<1x256xi1> to vector<1x256xi1>
    %14 = arith.xori %10, %13 : vector<1x256xi1>
    %15 = arith.andi %14, %8 : vector<1x256xi1>
    %16 = vector.broadcast %4 : i32 to vector<1x256xi32>
    %17 = arith.addi %6, %16 : vector<1x256xi32>
    %18 = arith.select %15, %17, %6 : vector<1x256xi1>, vector<1x256xi32>
    %c-2_i32 = arith.constant -2 : i32
    %19 = vector.broadcast %c-2_i32 : i32 to vector<1x256xi32>
    %20 = arith.addi %18, %19 : vector<1x256xi32>
    %c0_i32_4 = arith.constant 0 : i32
    %21 = vector.broadcast %c0_i32_4 : i32 to vector<1x256xi32>
    %22 = arith.cmpi sge, %20, %21 : vector<1x256xi32>
    %c-2_i32_5 = arith.constant -2 : i32
    %23 = vector.broadcast %c-2_i32_5 : i32 to vector<1x256xi32>
    %24 = arith.addi %18, %23 : vector<1x256xi32>
    %c16_i32_6 = arith.constant 16 : i32
    %25 = vector.broadcast %c16_i32_6 : i32 to vector<1x256xi32>
    %26 = arith.cmpi slt, %24, %25 : vector<1x256xi32>
    %27 = arith.andi %22, %26 : vector<1x256xi1>
    %28 = arith.extui %27 : vector<1x256xi1> to vector<1x256xi32>
    %29 = arith.sitofp %28 : vector<1x256xi32> to vector<1x256xf32>
    %c-1_i32 = arith.constant -1 : i32
    %30 = vector.broadcast %c-1_i32 : i32 to vector<1x256xi32>
    %31 = arith.addi %18, %30 : vector<1x256xi32>
    %c0_i32_7 = arith.constant 0 : i32
    %32 = vector.broadcast %c0_i32_7 : i32 to vector<1x256xi32>
    %33 = arith.cmpi sge, %31, %32 : vector<1x256xi32>
    %c-1_i32_8 = arith.constant -1 : i32
    %34 = vector.broadcast %c-1_i32_8 : i32 to vector<1x256xi32>
    %35 = arith.addi %18, %34 : vector<1x256xi32>
    %c16_i32_9 = arith.constant 16 : i32
    %36 = vector.broadcast %c16_i32_9 : i32 to vector<1x256xi32>
    %37 = arith.cmpi slt, %35, %36 : vector<1x256xi32>
    %38 = arith.andi %33, %37 : vector<1x256xi1>
    %39 = arith.extui %38 : vector<1x256xi1> to vector<1x256xi32>
    %40 = arith.sitofp %39 : vector<1x256xi32> to vector<1x256xf32>
    %c1_i32_10 = arith.constant 1 : i32
    %41 = vector.broadcast %c1_i32_10 : i32 to vector<1x256xi32>
    %42 = arith.addi %18, %41 : vector<1x256xi32>
    %c0_i32_11 = arith.constant 0 : i32
    %43 = vector.broadcast %c0_i32_11 : i32 to vector<1x256xi32>
    %44 = arith.cmpi sge, %42, %43 : vector<1x256xi32>
    %c1_i32_12 = arith.constant 1 : i32
    %45 = vector.broadcast %c1_i32_12 : i32 to vector<1x256xi32>
    %46 = arith.addi %18, %45 : vector<1x256xi32>
    %c16_i32_13 = arith.constant 16 : i32
    %47 = vector.broadcast %c16_i32_13 : i32 to vector<1x256xi32>
    %48 = arith.cmpi slt, %46, %47 : vector<1x256xi32>
    %49 = arith.andi %44, %48 : vector<1x256xi1>
    %50 = arith.extui %49 : vector<1x256xi1> to vector<1x256xi32>
    %51 = arith.sitofp %50 : vector<1x256xi32> to vector<1x256xf32>
    %c2_i32 = arith.constant 2 : i32
    %52 = vector.broadcast %c2_i32 : i32 to vector<1x256xi32>
    %53 = arith.addi %18, %52 : vector<1x256xi32>
    %c0_i32_14 = arith.constant 0 : i32
    %54 = vector.broadcast %c0_i32_14 : i32 to vector<1x256xi32>
    %55 = arith.cmpi sge, %53, %54 : vector<1x256xi32>
    %c2_i32_15 = arith.constant 2 : i32
    %56 = vector.broadcast %c2_i32_15 : i32 to vector<1x256xi32>
    %57 = arith.addi %18, %56 : vector<1x256xi32>
    %c16_i32_16 = arith.constant 16 : i32
    %58 = vector.broadcast %c16_i32_16 : i32 to vector<1x256xi32>
    %59 = arith.cmpi slt, %57, %58 : vector<1x256xi32>
    %60 = arith.andi %55, %59 : vector<1x256xi1>
    %61 = arith.extui %60 : vector<1x256xi1> to vector<1x256xi32>
    %62 = arith.sitofp %61 : vector<1x256xi32> to vector<1x256xf32>
    %c0_17 = arith.constant 0 : index
    %c0_18 = arith.constant 0 : index
    %c0_19 = arith.constant 0 : index
    %63 = vector.load %arg1[%c0_17, %c0_18, %c0_19] : memref<1x4x256xf32, #tpu.memory_space<vmem>>, vector<1x4x256xf32>
    %64 = vector.shape_cast %63 : vector<1x4x256xf32> to vector<4x256xf32>
    %c0_20 = arith.constant 0 : index
    %c128 = arith.constant 128 : index
    %65 = vector.load %arg7[%c0_20, %c128] : memref<4x512xf32, #tpu.memory_space<vmem>>, vector<4x256xf32>
    tpu.vector_store %arg7[%c0_20, %c128], %64 {strides = array<i32>} : memref<4x512xf32, #tpu.memory_space<vmem>>, vector<4x256xf32>,
    %c0_21 = arith.constant 0 : index
    %c111 = arith.constant 111 : index
    %66 = vector.load %arg7[%c0_21, %c111] : memref<4x512xf32, #tpu.memory_space<vmem>>, vector<4x256xf32>
    %67 = vector.broadcast %40 : vector<1x256xf32> to vector<4x256xf32>
    %68 = arith.mulf %66, %67 : vector<4x256xf32>
    %c0_22 = arith.constant 0 : index
    %c0_23 = arith.constant 0 : index
    %69 = vector.load %arg8[%c0_22, %c0_23] : memref<100x256xf32, #tpu.memory_space<vmem>>, vector<4x256xf32>
    tpu.vector_store %arg8[%c0_22, %c0_23], %68 {strides = array<i32>} : memref<100x256xf32, #tpu.memory_space<vmem>>, vector<4x256xf32>,
    %c0_24 = arith.constant 0 : index
    %c112 = arith.constant 112 : index
    %70 = vector.load %arg7[%c0_24, %c112] : memref<4x512xf32, #tpu.memory_space<vmem>>, vector<4x256xf32>
    %c4 = arith.constant 4 : index
    %c0_25 = arith.constant 0 : index
    %71 = vector.load %arg8[%c4, %c0_25] : memref<100x256xf32, #tpu.memory_space<vmem>>, vector<4x256xf32>
    tpu.vector_store %arg8[%c4, %c0_25], %70 {strides = array<i32>} : memref<100x256xf32, #tpu.memory_space<vmem>>, vector<4x256xf32>,
    %c0_26 = arith.constant 0 : index
    %c113 = arith.constant 113 : index
    %72 = vector.load %arg7[%c0_26, %c113] : memref<4x512xf32, #tpu.memory_space<vmem>>, vector<4x256xf32>
    %73 = vector.broadcast %51 : vector<1x256xf32> to vector<4x256xf32>
    %74 = arith.mulf %72, %73 : vector<4x256xf32>
    %c8 = arith.constant 8 : index
    %c0_27 = arith.constant 0 : index
    %75 = vector.load %arg8[%c8, %c0_27] : memref<100x256xf32, #tpu.memory_space<vmem>>, vector<4x256xf32>
    tpu.vector_store %arg8[%c8, %c0_27], %74 {strides = array<i32>} : memref<100x256xf32, #tpu.memory_space<vmem>>, vector<4x256xf32>,
    %c0_28 = arith.constant 0 : index
    %c127 = arith.constant 127 : index
    %76 = vector.load %arg7[%c0_28, %c127] : memref<4x512xf32, #tpu.memory_space<vmem>>, vector<4x256xf32>
    %77 = vector.broadcast %40 : vector<1x256xf32> to vector<4x256xf32>
    %78 = arith.mulf %76, %77 : vector<4x256xf32>
    %c12 = arith.constant 12 : index
    %c0_29 = arith.constant 0 : index
    %79 = vector.load %arg8[%c12, %c0_29] : memref<100x256xf32, #tpu.memory_space<vmem>>, vector<4x256xf32>
    tpu.vector_store %arg8[%c12, %c0_29], %78 {strides = array<i32>} : memref<100x256xf32, #tpu.memory_space<vmem>>, vector<4x256xf32>,
    %c0_30 = arith.constant 0 : index
    %c128_31 = arith.constant 128 : index
    %80 = vector.load %arg7[%c0_30, %c128_31] : memref<4x512xf32, #tpu.memory_space<vmem>>, vector<4x256xf32>
    %c16 = arith.constant 16 : index
    %c0_32 = arith.constant 0 : index
    %81 = vector.load %arg8[%c16, %c0_32] : memref<100x256xf32, #tpu.memory_space<vmem>>, vector<4x256xf32>
    tpu.vector_store %arg8[%c16, %c0_32], %80 {strides = array<i32>} : memref<100x256xf32, #tpu.memory_space<vmem>>, vector<4x256xf32>,
    %c0_33 = arith.constant 0 : index
    %c129 = arith.constant 129 : index
    %82 = vector.load %arg7[%c0_33, %c129] : memref<4x512xf32, #tpu.memory_space<vmem>>, vector<4x256xf32>
    %83 = vector.broadcast %51 : vector<1x256xf32> to vector<4x256xf32>
    %84 = arith.mulf %82, %83 : vector<4x256xf32>
    %c20 = arith.constant 20 : index
    %c0_34 = arith.constant 0 : index
    %85 = vector.load %arg8[%c20, %c0_34] : memref<100x256xf32, #tpu.memory_space<vmem>>, vector<4x256xf32>
    tpu.vector_store %arg8[%c20, %c0_34], %84 {strides = array<i32>} : memref<100x256xf32, #tpu.memory_space<vmem>>, vector<4x256xf32>,
    %c0_35 = arith.constant 0 : index
    %c143 = arith.constant 143 : index
    %86 = vector.load %arg7[%c0_35, %c143] : memref<4x512xf32, #tpu.memory_space<vmem>>, vector<4x256xf32>
    %87 = vector.broadcast %40 : vector<1x256xf32> to vector<4x256xf32>
    %88 = arith.mulf %86, %87 : vector<4x256xf32>
    %c24 = arith.constant 24 : index
    %c0_36 = arith.constant 0 : index
    %89 = vector.load %arg8[%c24, %c0_36] : memref<100x256xf32, #tpu.memory_space<vmem>>, vector<4x256xf32>
    tpu.vector_store %arg8[%c24, %c0_36], %88 {strides = array<i32>} : memref<100x256xf32, #tpu.memory_space<vmem>>, vector<4x256xf32>,
    %c0_37 = arith.constant 0 : index
    %c144 = arith.constant 144 : index
    %90 = vector.load %arg7[%c0_37, %c144] : memref<4x512xf32, #tpu.memory_space<vmem>>, vector<4x256xf32>
    %c28 = arith.constant 28 : index
    %c0_38 = arith.constant 0 : index
    %91 = vector.load %arg8[%c28, %c0_38] : memref<100x256xf32, #tpu.memory_space<vmem>>, vector<4x256xf32>
    tpu.vector_store %arg8[%c28, %c0_38], %90 {strides = array<i32>} : memref<100x256xf32, #tpu.memory_space<vmem>>, vector<4x256xf32>,
    %c0_39 = arith.constant 0 : index
    %c145 = arith.constant 145 : index
    %92 = vector.load %arg7[%c0_39, %c145] : memref<4x512xf32, #tpu.memory_space<vmem>>, vector<4x256xf32>
    %93 = vector.broadcast %51 : vector<1x256xf32> to vector<4x256xf32>
    %94 = arith.mulf %92, %93 : vector<4x256xf32>
    %c32 = arith.constant 32 : index
    %c0_40 = arith.constant 0 : index
    %95 = vector.load %arg8[%c32, %c0_40] : memref<100x256xf32, #tpu.memory_space<vmem>>, vector<4x256xf32>
    tpu.vector_store %arg8[%c32, %c0_40], %94 {strides = array<i32>} : memref<100x256xf32, #tpu.memory_space<vmem>>, vector<4x256xf32>,
    %c0_41 = arith.constant 0 : index
    %c0_42 = arith.constant 0 : index
    %96 = vector.load %arg2[%c0_41, %c0_42] : memref<4x36xf32, #tpu.memory_space<vmem>>, vector<4x36xf32>
    %c0_43 = arith.constant 0 : index
    %c0_44 = arith.constant 0 : index
    %97 = vector.load %arg8[%c0_43, %c0_44] : memref<100x256xf32, #tpu.memory_space<vmem>>, vector<36x256xf32>
    %cst_45 = arith.constant dense<0.000000e+00> : vector<4x256xf32>
    %98 = tpu.matmul %96, %97, %cst_45 {dimension_numbers = #tpu.dot_dimension_numbers<[1], [0], [0], [1], [0, 0, 1, 1], [], []>} : vector<4x36xf32>, vector<36x256xf32>, vector<4x256xf32> -> vector<4x256xf32>
    %c0_46 = arith.constant 0 : index
    %c0_47 = arith.constant 0 : index
    %99 = vector.load %arg3[%c0_46, %c0_47] : memref<4x1xf32, #tpu.memory_space<vmem>>, vector<4x1xf32>
    %100 = vector.broadcast %99 : vector<4x1xf32> to vector<4x256xf32>
    %101 = arith.addf %98, %100 : vector<4x256xf32>
    %cst_48 = arith.constant 0.000000e+00 : f32
    %102 = vector.broadcast %cst_48 : f32 to vector<4x256xf32>
    %103 = arith.maximumf %101, %102 : vector<4x256xf32>
    %104 = arith.addf %103, %64 : vector<4x256xf32>
    %c0_49 = arith.constant 0 : index
    %c128_50 = arith.constant 128 : index
    %105 = vector.load %arg7[%c0_49, %c128_50] : memref<4x512xf32, #tpu.memory_space<vmem>>, vector<4x256xf32>
    tpu.vector_store %arg7[%c0_49, %c128_50], %104 {strides = array<i32>} : memref<4x512xf32, #tpu.memory_space<vmem>>, vector<4x256xf32>,
    %c0_51 = arith.constant 0 : index
    %c94 = arith.constant 94 : index
    %106 = vector.load %arg7[%c0_51, %c94] : memref<4x512xf32, #tpu.memory_space<vmem>>, vector<4x256xf32>
    %107 = vector.broadcast %29 : vector<1x256xf32> to vector<4x256xf32>
    %108 = arith.mulf %106, %107 : vector<4x256xf32>
    %c0_52 = arith.constant 0 : index
    %c0_53 = arith.constant 0 : index
    %109 = vector.load %arg8[%c0_52, %c0_53] : memref<100x256xf32, #tpu.memory_space<vmem>>, vector<4x256xf32>
    tpu.vector_store %arg8[%c0_52, %c0_53], %108 {strides = array<i32>} : memref<100x256xf32, #tpu.memory_space<vmem>>, vector<4x256xf32>,
    %c0_54 = arith.constant 0 : index
    %c95 = arith.constant 95 : index
    %110 = vector.load %arg7[%c0_54, %c95] : memref<4x512xf32, #tpu.memory_space<vmem>>, vector<4x256xf32>
    %111 = vector.broadcast %40 : vector<1x256xf32> to vector<4x256xf32>
    %112 = arith.mulf %110, %111 : vector<4x256xf32>
    %c4_55 = arith.constant 4 : index
    %c0_56 = arith.constant 0 : index
    %113 = vector.load %arg8[%c4_55, %c0_56] : memref<100x256xf32, #tpu.memory_space<vmem>>, vector<4x256xf32>
    tpu.vector_store %arg8[%c4_55, %c0_56], %112 {strides = array<i32>} : memref<100x256xf32, #tpu.memory_space<vmem>>, vector<4x256xf32>,
    %c0_57 = arith.constant 0 : index
    %c96 = arith.constant 96 : index
    %114 = vector.load %arg7[%c0_57, %c96] : memref<4x512xf32, #tpu.memory_space<vmem>>, vector<4x256xf32>
    %c8_58 = arith.constant 8 : index
    %c0_59 = arith.constant 0 : index
    %115 = vector.load %arg8[%c8_58, %c0_59] : memref<100x256xf32, #tpu.memory_space<vmem>>, vector<4x256xf32>
    tpu.vector_store %arg8[%c8_58, %c0_59], %114 {strides = array<i32>} : memref<100x256xf32, #tpu.memory_space<vmem>>, vector<4x256xf32>,
    %c0_60 = arith.constant 0 : index
    %c97 = arith.constant 97 : index
    %116 = vector.load %arg7[%c0_60, %c97] : memref<4x512xf32, #tpu.memory_space<vmem>>, vector<4x256xf32>
    %117 = vector.broadcast %51 : vector<1x256xf32> to vector<4x256xf32>
    %118 = arith.mulf %116, %117 : vector<4x256xf32>
    %c12_61 = arith.constant 12 : index
    %c0_62 = arith.constant 0 : index
    %119 = vector.load %arg8[%c12_61, %c0_62] : memref<100x256xf32, #tpu.memory_space<vmem>>, vector<4x256xf32>
    tpu.vector_store %arg8[%c12_61, %c0_62], %118 {strides = array<i32>} : memref<100x256xf32, #tpu.memory_space<vmem>>, vector<4x256xf32>,
    %c0_63 = arith.constant 0 : index
    %c98 = arith.constant 98 : index
    %120 = vector.load %arg7[%c0_63, %c98] : memref<4x512xf32, #tpu.memory_space<vmem>>, vector<4x256xf32>
    %121 = vector.broadcast %62 : vector<1x256xf32> to vector<4x256xf32>
    %122 = arith.mulf %120, %121 : vector<4x256xf32>
    %c16_64 = arith.constant 16 : index
    %c0_65 = arith.constant 0 : index
    %123 = vector.load %arg8[%c16_64, %c0_65] : memref<100x256xf32, #tpu.memory_space<vmem>>, vector<4x256xf32>
    tpu.vector_store %arg8[%c16_64, %c0_65], %122 {strides = array<i32>} : memref<100x256xf32, #tpu.memory_space<vmem>>, vector<4x256xf32>,
    %c0_66 = arith.constant 0 : index
    %c110 = arith.constant 110 : index
    %124 = vector.load %arg7[%c0_66, %c110] : memref<4x512xf32, #tpu.memory_space<vmem>>, vector<4x256xf32>
    %125 = vector.broadcast %29 : vector<1x256xf32> to vector<4x256xf32>
    %126 = arith.mulf %124, %125 : vector<4x256xf32>
    %c20_67 = arith.constant 20 : index
    %c0_68 = arith.constant 0 : index
    %127 = vector.load %arg8[%c20_67, %c0_68] : memref<100x256xf32, #tpu.memory_space<vmem>>, vector<4x256xf32>
    tpu.vector_store %arg8[%c20_67, %c0_68], %126 {strides = array<i32>} : memref<100x256xf32, #tpu.memory_space<vmem>>, vector<4x256xf32>,
    %c0_69 = arith.constant 0 : index
    %c111_70 = arith.constant 111 : index
    %128 = vector.load %arg7[%c0_69, %c111_70] : memref<4x512xf32, #tpu.memory_space<vmem>>, vector<4x256xf32>
    %129 = vector.broadcast %40 : vector<1x256xf32> to vector<4x256xf32>
    %130 = arith.mulf %128, %129 : vector<4x256xf32>
    %c24_71 = arith.constant 24 : index
    %c0_72 = arith.constant 0 : index
    %131 = vector.load %arg8[%c24_71, %c0_72] : memref<100x256xf32, #tpu.memory_space<vmem>>, vector<4x256xf32>
    tpu.vector_store %arg8[%c24_71, %c0_72], %130 {strides = array<i32>} : memref<100x256xf32, #tpu.memory_space<vmem>>, vector<4x256xf32>,
    %c0_73 = arith.constant 0 : index
    %c112_74 = arith.constant 112 : index
    %132 = vector.load %arg7[%c0_73, %c112_74] : memref<4x512xf32, #tpu.memory_space<vmem>>, vector<4x256xf32>
    %c28_75 = arith.constant 28 : index
    %c0_76 = arith.constant 0 : index
    %133 = vector.load %arg8[%c28_75, %c0_76] : memref<100x256xf32, #tpu.memory_space<vmem>>, vector<4x256xf32>
    tpu.vector_store %arg8[%c28_75, %c0_76], %132 {strides = array<i32>} : memref<100x256xf32, #tpu.memory_space<vmem>>, vector<4x256xf32>,
    %c0_77 = arith.constant 0 : index
    %c113_78 = arith.constant 113 : index
    %134 = vector.load %arg7[%c0_77, %c113_78] : memref<4x512xf32, #tpu.memory_space<vmem>>, vector<4x256xf32>
    %135 = vector.broadcast %51 : vector<1x256xf32> to vector<4x256xf32>
    %136 = arith.mulf %134, %135 : vector<4x256xf32>
    %c32_79 = arith.constant 32 : index
    %c0_80 = arith.constant 0 : index
    %137 = vector.load %arg8[%c32_79, %c0_80] : memref<100x256xf32, #tpu.memory_space<vmem>>, vector<4x256xf32>
    tpu.vector_store %arg8[%c32_79, %c0_80], %136 {strides = array<i32>} : memref<100x256xf32, #tpu.memory_space<vmem>>, vector<4x256xf32>,
    %c0_81 = arith.constant 0 : index
    %c114 = arith.constant 114 : index
    %138 = vector.load %arg7[%c0_81, %c114] : memref<4x512xf32, #tpu.memory_space<vmem>>, vector<4x256xf32>
    %139 = vector.broadcast %62 : vector<1x256xf32> to vector<4x256xf32>
    %140 = arith.mulf %138, %139 : vector<4x256xf32>
    %c36 = arith.constant 36 : index
    %c0_82 = arith.constant 0 : index
    %141 = vector.load %arg8[%c36, %c0_82] : memref<100x256xf32, #tpu.memory_space<vmem>>, vector<4x256xf32>
    tpu.vector_store %arg8[%c36, %c0_82], %140 {strides = array<i32>} : memref<100x256xf32, #tpu.memory_space<vmem>>, vector<4x256xf32>,
    %c0_83 = arith.constant 0 : index
    %c126 = arith.constant 126 : index
    %142 = vector.load %arg7[%c0_83, %c126] : memref<4x512xf32, #tpu.memory_space<vmem>>, vector<4x256xf32>
    %143 = vector.broadcast %29 : vector<1x256xf32> to vector<4x256xf32>
    %144 = arith.mulf %142, %143 : vector<4x256xf32>
    %c40 = arith.constant 40 : index
    %c0_84 = arith.constant 0 : index
    %145 = vector.load %arg8[%c40, %c0_84] : memref<100x256xf32, #tpu.memory_space<vmem>>, vector<4x256xf32>
    tpu.vector_store %arg8[%c40, %c0_84], %144 {strides = array<i32>} : memref<100x256xf32, #tpu.memory_space<vmem>>, vector<4x256xf32>,
    %c0_85 = arith.constant 0 : index
    %c127_86 = arith.constant 127 : index
    %146 = vector.load %arg7[%c0_85, %c127_86] : memref<4x512xf32, #tpu.memory_space<vmem>>, vector<4x256xf32>
    %147 = vector.broadcast %40 : vector<1x256xf32> to vector<4x256xf32>
    %148 = arith.mulf %146, %147 : vector<4x256xf32>
    %c44 = arith.constant 44 : index
    %c0_87 = arith.constant 0 : index
    %149 = vector.load %arg8[%c44, %c0_87] : memref<100x256xf32, #tpu.memory_space<vmem>>, vector<4x256xf32>
    tpu.vector_store %arg8[%c44, %c0_87], %148 {strides = array<i32>} : memref<100x256xf32, #tpu.memory_space<vmem>>, vector<4x256xf32>,
    %c0_88 = arith.constant 0 : index
    %c128_89 = arith.constant 128 : index
    %150 = vector.load %arg7[%c0_88, %c128_89] : memref<4x512xf32, #tpu.memory_space<vmem>>, vector<4x256xf32>
    %c48 = arith.constant 48 : index
    %c0_90 = arith.constant 0 : index
    %151 = vector.load %arg8[%c48, %c0_90] : memref<100x256xf32, #tpu.memory_space<vmem>>, vector<4x256xf32>
    tpu.vector_store %arg8[%c48, %c0_90], %150 {strides = array<i32>} : memref<100x256xf32, #tpu.memory_space<vmem>>, vector<4x256xf32>,
    %c0_91 = arith.constant 0 : index
    %c129_92 = arith.constant 129 : index
    %152 = vector.load %arg7[%c0_91, %c129_92] : memref<4x512xf32, #tpu.memory_space<vmem>>, vector<4x256xf32>
    %153 = vector.broadcast %51 : vector<1x256xf32> to vector<4x256xf32>
    %154 = arith.mulf %152, %153 : vector<4x256xf32>
    %c52 = arith.constant 52 : index
    %c0_93 = arith.constant 0 : index
    %155 = vector.load %arg8[%c52, %c0_93] : memref<100x256xf32, #tpu.memory_space<vmem>>, vector<4x256xf32>
    tpu.vector_store %arg8[%c52, %c0_93], %154 {strides = array<i32>} : memref<100x256xf32, #tpu.memory_space<vmem>>, vector<4x256xf32>,
    %c0_94 = arith.constant 0 : index
    %c130 = arith.constant 130 : index
    %156 = vector.load %arg7[%c0_94, %c130] : memref<4x512xf32, #tpu.memory_space<vmem>>, vector<4x256xf32>
    %157 = vector.broadcast %62 : vector<1x256xf32> to vector<4x256xf32>
    %158 = arith.mulf %156, %157 : vector<4x256xf32>
    %c56 = arith.constant 56 : index
    %c0_95 = arith.constant 0 : index
    %159 = vector.load %arg8[%c56, %c0_95] : memref<100x256xf32, #tpu.memory_space<vmem>>, vector<4x256xf32>
    tpu.vector_store %arg8[%c56, %c0_95], %158 {strides = array<i32>} : memref<100x256xf32, #tpu.memory_space<vmem>>, vector<4x256xf32>,
    %c0_96 = arith.constant 0 : index
    %c142 = arith.constant 142 : index
    %160 = vector.load %arg7[%c0_96, %c142] : memref<4x512xf32, #tpu.memory_space<vmem>>, vector<4x256xf32>
    %161 = vector.broadcast %29 : vector<1x256xf32> to vector<4x256xf32>
    %162 = arith.mulf %160, %161 : vector<4x256xf32>
    %c60 = arith.constant 60 : index
    %c0_97 = arith.constant 0 : index
    %163 = vector.load %arg8[%c60, %c0_97] : memref<100x256xf32, #tpu.memory_space<vmem>>, vector<4x256xf32>
    tpu.vector_store %arg8[%c60, %c0_97], %162 {strides = array<i32>} : memref<100x256xf32, #tpu.memory_space<vmem>>, vector<4x256xf32>,
    %c0_98 = arith.constant 0 : index
    %c143_99 = arith.constant 143 : index
    %164 = vector.load %arg7[%c0_98, %c143_99] : memref<4x512xf32, #tpu.memory_space<vmem>>, vector<4x256xf32>
    %165 = vector.broadcast %40 : vector<1x256xf32> to vector<4x256xf32>
    %166 = arith.mulf %164, %165 : vector<4x256xf32>
    %c64 = arith.constant 64 : index
    %c0_100 = arith.constant 0 : index
    %167 = vector.load %arg8[%c64, %c0_100] : memref<100x256xf32, #tpu.memory_space<vmem>>, vector<4x256xf32>
    tpu.vector_store %arg8[%c64, %c0_100], %166 {strides = array<i32>} : memref<100x256xf32, #tpu.memory_space<vmem>>, vector<4x256xf32>,
    %c0_101 = arith.constant 0 : index
    %c144_102 = arith.constant 144 : index
    %168 = vector.load %arg7[%c0_101, %c144_102] : memref<4x512xf32, #tpu.memory_space<vmem>>, vector<4x256xf32>
    %c68 = arith.constant 68 : index
    %c0_103 = arith.constant 0 : index
    %169 = vector.load %arg8[%c68, %c0_103] : memref<100x256xf32, #tpu.memory_space<vmem>>, vector<4x256xf32>
    tpu.vector_store %arg8[%c68, %c0_103], %168 {strides = array<i32>} : memref<100x256xf32, #tpu.memory_space<vmem>>, vector<4x256xf32>,
    %c0_104 = arith.constant 0 : index
    %c145_105 = arith.constant 145 : index
    %170 = vector.load %arg7[%c0_104, %c145_105] : memref<4x512xf32, #tpu.memory_space<vmem>>, vector<4x256xf32>
    %171 = vector.broadcast %51 : vector<1x256xf32> to vector<4x256xf32>
    %172 = arith.mulf %170, %171 : vector<4x256xf32>
    %c72 = arith.constant 72 : index
    %c0_106 = arith.constant 0 : index
    %173 = vector.load %arg8[%c72, %c0_106] : memref<100x256xf32, #tpu.memory_space<vmem>>, vector<4x256xf32>
    tpu.vector_store %arg8[%c72, %c0_106], %172 {strides = array<i32>} : memref<100x256xf32, #tpu.memory_space<vmem>>, vector<4x256xf32>,
    %c0_107 = arith.constant 0 : index
    %c146 = arith.constant 146 : index
    %174 = vector.load %arg7[%c0_107, %c146] : memref<4x512xf32, #tpu.memory_space<vmem>>, vector<4x256xf32>
    %175 = vector.broadcast %62 : vector<1x256xf32> to vector<4x256xf32>
    %176 = arith.mulf %174, %175 : vector<4x256xf32>
    %c76 = arith.constant 76 : index
    %c0_108 = arith.constant 0 : index
    %177 = vector.load %arg8[%c76, %c0_108] : memref<100x256xf32, #tpu.memory_space<vmem>>, vector<4x256xf32>
    tpu.vector_store %arg8[%c76, %c0_108], %176 {strides = array<i32>} : memref<100x256xf32, #tpu.memory_space<vmem>>, vector<4x256xf32>,
    %c0_109 = arith.constant 0 : index
    %c158 = arith.constant 158 : index
    %178 = vector.load %arg7[%c0_109, %c158] : memref<4x512xf32, #tpu.memory_space<vmem>>, vector<4x256xf32>
    %179 = vector.broadcast %29 : vector<1x256xf32> to vector<4x256xf32>
    %180 = arith.mulf %178, %179 : vector<4x256xf32>
    %c80 = arith.constant 80 : index
    %c0_110 = arith.constant 0 : index
    %181 = vector.load %arg8[%c80, %c0_110] : memref<100x256xf32, #tpu.memory_space<vmem>>, vector<4x256xf32>
    tpu.vector_store %arg8[%c80, %c0_110], %180 {strides = array<i32>} : memref<100x256xf32, #tpu.memory_space<vmem>>, vector<4x256xf32>,
    %c0_111 = arith.constant 0 : index
    %c159 = arith.constant 159 : index
    %182 = vector.load %arg7[%c0_111, %c159] : memref<4x512xf32, #tpu.memory_space<vmem>>, vector<4x256xf32>
    %183 = vector.broadcast %40 : vector<1x256xf32> to vector<4x256xf32>
    %184 = arith.mulf %182, %183 : vector<4x256xf32>
    %c84 = arith.constant 84 : index
    %c0_112 = arith.constant 0 : index
    %185 = vector.load %arg8[%c84, %c0_112] : memref<100x256xf32, #tpu.memory_space<vmem>>, vector<4x256xf32>
    tpu.vector_store %arg8[%c84, %c0_112], %184 {strides = array<i32>} : memref<100x256xf32, #tpu.memory_space<vmem>>, vector<4x256xf32>,
    %c0_113 = arith.constant 0 : index
    %c160 = arith.constant 160 : index
    %186 = vector.load %arg7[%c0_113, %c160] : memref<4x512xf32, #tpu.memory_space<vmem>>, vector<4x256xf32>
    %c88 = arith.constant 88 : index
    %c0_114 = arith.constant 0 : index
    %187 = vector.load %arg8[%c88, %c0_114] : memref<100x256xf32, #tpu.memory_space<vmem>>, vector<4x256xf32>
    tpu.vector_store %arg8[%c88, %c0_114], %186 {strides = array<i32>} : memref<100x256xf32, #tpu.memory_space<vmem>>, vector<4x256xf32>,
    %c0_115 = arith.constant 0 : index
    %c161 = arith.constant 161 : index
    %188 = vector.load %arg7[%c0_115, %c161] : memref<4x512xf32, #tpu.memory_space<vmem>>, vector<4x256xf32>
    %189 = vector.broadcast %51 : vector<1x256xf32> to vector<4x256xf32>
    %190 = arith.mulf %188, %189 : vector<4x256xf32>
    %c92 = arith.constant 92 : index
    %c0_116 = arith.constant 0 : index
    %191 = vector.load %arg8[%c92, %c0_116] : memref<100x256xf32, #tpu.memory_space<vmem>>, vector<4x256xf32>
    tpu.vector_store %arg8[%c92, %c0_116], %190 {strides = array<i32>} : memref<100x256xf32, #tpu.memory_space<vmem>>, vector<4x256xf32>,
    %c0_117 = arith.constant 0 : index
    %c162 = arith.constant 162 : index
    %192 = vector.load %arg7[%c0_117, %c162] : memref<4x512xf32, #tpu.memory_space<vmem>>, vector<4x256xf32>
    %193 = vector.broadcast %62 : vector<1x256xf32> to vector<4x256xf32>
    %194 = arith.mulf %192, %193 : vector<4x256xf32>
    %c96_118 = arith.constant 96 : index
    %c0_119 = arith.constant 0 : index
    %195 = vector.load %arg8[%c96_118, %c0_119] : memref<100x256xf32, #tpu.memory_space<vmem>>, vector<4x256xf32>
    tpu.vector_store %arg8[%c96_118, %c0_119], %194 {strides = array<i32>} : memref<100x256xf32, #tpu.memory_space<vmem>>, vector<4x256xf32>,
    %c0_120 = arith.constant 0 : index
    %c0_121 = arith.constant 0 : index
    %196 = vector.load %arg4[%c0_120, %c0_121] : memref<4x100xf32, #tpu.memory_space<vmem>>, vector<4x100xf32>
    %c0_122 = arith.constant 0 : index
    %c0_123 = arith.constant 0 : index
    %197 = vector.load %arg8[%c0_122, %c0_123] : memref<100x256xf32, #tpu.memory_space<vmem>>, vector<100x256xf32>
    %cst_124 = arith.constant dense<0.000000e+00> : vector<4x256xf32>
    %198 = tpu.matmul %196, %197, %cst_124 {dimension_numbers = #tpu.dot_dimension_numbers<[1], [0], [0], [1], [0, 0, 1, 1], [], []>} : vector<4x100xf32>, vector<100x256xf32>, vector<4x256xf32> -> vector<4x256xf32>
    %c0_125 = arith.constant 0 : index
    %c0_126 = arith.constant 0 : index
    %199 = vector.load %arg5[%c0_125, %c0_126] : memref<4x1xf32, #tpu.memory_space<vmem>>, vector<4x1xf32>
    %200 = vector.broadcast %199 : vector<4x1xf32> to vector<4x256xf32>
    %201 = arith.addf %198, %200 : vector<4x256xf32>
    %cst_127 = arith.constant 0.000000e+00 : f32
    %202 = vector.broadcast %cst_127 : f32 to vector<4x256xf32>
    %203 = arith.maximumf %201, %202 : vector<4x256xf32>
    %204 = arith.addf %203, %104 : vector<4x256xf32>
    %c0_128 = arith.constant 0 : index
    %c0_129 = arith.constant 0 : index
    %c0_130 = arith.constant 0 : index
    %205 = vector.load %arg6[%c0_128, %c0_129, %c0_130] : memref<1x4x256xf32, #tpu.memory_space<vmem>>, vector<1x4x256xf32>
    %206 = vector.shape_cast %205 : vector<1x4x256xf32> to vector<4x256xf32>
    %207 = vector.shape_cast %204 : vector<4x256xf32> to vector<1x4x256xf32>
    tpu.vector_store %arg6[%c0_128, %c0_129, %c0_130], %207 {strides = array<i32>} : memref<1x4x256xf32, #tpu.memory_space<vmem>>, vector<1x4x256xf32>,
    return
  }
  func.func @transform_0(%arg0: i32) -> (i32, i32, i32) {
    %c0_i32 = arith.constant 0 : i32
    %c0_i32_0 = arith.constant 0 : i32
    %c0_i32_1 = arith.constant 0 : i32
    return %arg0, %c0_i32, %c0_i32_0 : i32, i32, i32
  }
  func.func @transform_1(%arg0: i32) -> (i32, i32) {
    %c0_i32 = arith.constant 0 : i32
    %c0_i32_0 = arith.constant 0 : i32
    %c0_i32_1 = arith.constant 0 : i32
    return %c0_i32, %c0_i32_0 : i32, i32
  }
  func.func @transform_2(%arg0: i32) -> (i32, i32) {
    %c0_i32 = arith.constant 0 : i32
    %c0_i32_0 = arith.constant 0 : i32
    %c0_i32_1 = arith.constant 0 : i32
    return %c0_i32, %c0_i32_0 : i32, i32
  }
  func.func @transform_3(%arg0: i32) -> (i32, i32) {
    %c0_i32 = arith.constant 0 : i32
    %c0_i32_0 = arith.constant 0 : i32
    %c0_i32_1 = arith.constant 0 : i32
    return %c0_i32, %c0_i32_0 : i32, i32
  }
  func.func @transform_4(%arg0: i32) -> (i32, i32) {
    %c0_i32 = arith.constant 0 : i32
    %c0_i32_0 = arith.constant 0 : i32
    %c0_i32_1 = arith.constant 0 : i32
    return %c0_i32, %c0_i32_0 : i32, i32
  }
  func.func @transform_5(%arg0: i32) -> (i32, i32, i32) {
    %c0_i32 = arith.constant 0 : i32
    %c0_i32_0 = arith.constant 0 : i32
    %c0_i32_1 = arith.constant 0 : i32
    return %arg0, %c0_i32, %c0_i32_0 : i32, i32, i32
  }
}

</mosaic_0001>

<bundles_post_ra>
// kernel: tpu_custom_call.1
= control target key start
LH: loop header
LB: loop body
LE: loop exit
PB: predicated region body
PF: predicated region fallthrough
CT: control target
= control target key end

     0   :  { %10 = vsyncpa [#allocation5], 0  ;;  %s2436_s0 = inlined_call_operand.hbm [shape: f32[2,4,256], index: 0, kind: input, shape index: {}]   ;;  %s2437_s1 = inlined_call_operand.vmem [shape: f32[4,36], index: 1, kind: input, shape index: {}]   ;;  %s2438_s2 = inlined_call_operand.vmem [shape: f32[4,1], index: 2, kind: input, shape index: {}]   ;;  %s2439_s3 = inlined_call_operand.vmem [shape: f32[4,100], index: 3, kind: input, shape index: {}]   ;;  %s2440_s4 = inlined_call_operand.vmem [shape: f32[4,1], index: 4, kind: input, shape index: {}]   ;;  %s2441_s5 = inlined_call_operand.hbm [shape: f32[2,4,256], index: 5, kind: output, shape index: {}]  }
   0x1   :  { %12 = vsyncpa [#allocation5 + $0x1], 0 }
   0x2   :  { %13 = vsyncpa [#allocation6], 0 }
   0x3   :  { %15 = vsyncpa [#allocation6 + $0x1], 0  ;;  %s1685_s18 = smov 0   ;;  %s1687_s19 = smov 0  }
   0x4   :  { %s1689_s20 = smov 0   ;;  %s1691_s21 = smov 0  }
   0x5 LB: > { %s1706_s22 = sadd.s32 4294967295, %s1625_s21   ;;  %s1419_s23 = sadd.s32 4294967294, %s1625_s21   ;;  %s1625_s21 = sphi %s1691_s21, %s2524_s21   ;;  %s1621_s20 = sphi %s1689_s20, %s2523_s20   ;;  %s1617_s19 = sphi %s1687_s19, %s2522_s19   ;;  %s1613_s18 = sphi %s1685_s18, %s2521_s18  }
   0x6   : > { %s1710_s24 = sadd.s32 1, %s1625_s21   ;;  %s28_s25 = sadd.s32 1, %s1621_s20 }
   0x7   : > { %s25_s26 = ssub.s32 %s1625_s21, %s1710_s24  ;;  %p35_p0 = scmp.ne.s32.totalorder %s1621_s20, %s1617_s19 }
   0x8   : > { %p26_p1 = scmp.eq.s32.totalorder %s25_s26, 0  ;;  %p36_p2 = scmp.eq.s32.totalorder %s1625_s21, 0 }
   0x9   : > { %p41_p3 = scmp.ne.s32.totalorder %s1617_s19, %s1613_s18  ;;  %p42_p4 = scmp.eq.s32.totalorder %s1706_s22, 0 }
   0xa   : > { %s1722_s27 = scalar_select %p26_p1, %s1621_s20, %s28_s25  }
   0xb   : > { %p1724_p5 = por %p36_p2, %p35_p0  ;;  %p1728_p6 = por %p42_p4, %p41_p3 }
   0xc   : > { %p149_p7 = scmp.eq.s32.totalorder %s1706_s22, 1  ;;  %p155_p8 = scmp.eq.s32.totalorder %s1419_s23, 1 }
   0xd   : > { %s2479_s29 = scalar_select %p1728_p6, 1, 0 }
   0xe   : > { %p1461_p10 = scmp.lt.s32.totalorder %s1625_s21, 2  ;;  %p1735_p11 = por %p149_p7, %p35_p0 }
   0xf   : > { %p1739_p12 = por %p155_p8, %p41_p3  ;;  %s187_s7 = sand.u32 1, %s1621_s20  }
  0x10   : > { %s2480_s30 = scalar_select %p1735_p11, 1, 0 }
  0x11   : > { %s2481_s6 = scalar_select %p1739_p12, 1, 0 }
  0x12   : > { %s1447_s8 = sshll.u32 %s1625_s21, 7  ;;  %s1422_s9 = sshll.u32 %s187_s7, 3 }
  0x13   : > { %s1748_s12 = scalar_lea.hbm %s2436_s0, %s1447_s8  ;;  %s191_s13 = scalar_lea.vmem [#allocation4], %s1422_s9 }
  0x14   : > { %s199_s14 = sshll.u32 %s191_s13, 4  ;;  %p1752_p13 = pnand %p1461_p10, %p1724_p5  ;;  %s1756_s14 = int_to_ptr.vmem [resolvable:$true] %s199_s14 }
  0x15   : > { %s188_s16 = scalar_lea.sflag [#allocation5], %s187_s7  ;;  %s1533_s17 = scalar_lea.hbm %s1748_s12, 128 }
  0x16   : > { %p1534_p2 = scmp.ne.s32.totalorder %s1748_s12, %s1533_s17  ;;  %p1535_p3 = pneg %p1752_p13 }
  0x17   : > { %s1538_s26 = scalar_lea.hbm %s2436_s0, 256  ;;  %p1539_p5 = scmp.lt.s32.totalorder %s1748_s12, %s2436_s0 }
  0x18   : > { %p1536_p4 = pnand %p1535_p3, %p1534_p2  ;;  %p1540_p8 = scmp.lt.s32.totalorder %s1538_s26, %s1533_s17 }
  0x1a   : > { %p1537_p7 = pneg %p1536_p4  ;;  %p1541_p10 = por %p1540_p8, %p1539_p5 }
  0x1c   : > { %p1542_p9 = pnand %p1541_p10, %p1537_p7 }
  0x1e   : > { %1545 = shalt.err (!%p1542_p9)
}
  0x1f   : > { %s1546_s7 = scalar_lea.vmem %s1756_s14, 128  ;;  %s1627_s9 = smov [#allocation4]  }
  0x20   : > { %p1547_p0 = scmp.ne.s32.totalorder %s1756_s14, %s1546_s7  ;;  %s1551_s10 = sshll.u32 %s1627_s9, 4  ;;  %s1552_s10 = int_to_ptr.vmem [resolvable:$false] %s1551_s10 }
  0x21   : > { %s1553_s11 = scalar_lea.vmem %s1552_s10, 256  ;;  %p1554_p4 = scmp.lt.s32.totalorder %s1756_s14, %s1552_s10 }
  0x22   : > { %p1549_p1 = pnand %p1547_p0, %p1535_p3  ;;  %p1555_p12 = scmp.lt.s32.totalorder %s1553_s11, %s1546_s7 }
  0x24   : > { %p1550_p2 = pneg %p1549_p1  ;;  %p1556_p11 = por %p1555_p12, %p1554_p4 }
  0x26   : > { %p1557_p6 = pnand %p1556_p11, %p1550_p2 }
  0x28   : > { %1560 = shalt.err (!%p1557_p6)
}
  0x29   : > { %1456 = dma.hbm_to_vmem [thread:$0]  (!%p1752_p13), %s1748_s12, 128, %s1756_s14, %s188_s16  }
  0x2a   : > { %p2483_p9 = scmp.lt.s32.totalorder %s1625_s21, 3  ;;  %p2484_p7 = scmp.ge.s32.totalorder %s1625_s21, 1 }
  0x2c   : > { %p205_p0 = pnand %p2484_p7, %p2483_p9 }
  0x2d   : > { %s1783_s13 = sand.u32 (!%p205_p0), 1, %s1617_s19   ;;  %p2485_p6 = scmp.ne.s32.totalorder (!%p205_p0), %s2479_s29, 0 }
  0x2e   : > { %208 = sbr.rel (%p205_p0) target bundleno = 1025 (0x401), region = 40  ;;  %s2444_s17 = sshll.u32 (!%p205_p0), %s1783_s13, 3 }
  0x2f   : > { %s211_s23 = scalar_lea.sflag (!%p205_p0), [#allocation5], %s1783_s13  ;;  %s214_s15 = scalar_lea.vmem (!%p205_p0), [#allocation4], %s2444_s17 }
  0x33   : > { %v243_v0 = vlaneseq }
  0x34   : > { %1604 = dma.done.wait (%p2485_p6), %s211_s23, 128  }
  0x35   : > { %1606 = vsyncadd (%p2485_p6), %s211_s23, 4294967168  ;;  %v1628_v1 = vmov 0.0   ;;  %v244_v2 = vand.u32 127, %v243_v0  ;;  %v1797_v8 = vld [vmem:[%s214_s15] sm:$0xff]  ;;  %s2463_s29 = smov 1   ;;  %s2455_s12 = smov 17  }
  0x36   : > { %241 = vst [vmem:[#allocation2] sm:$0xff] %v1628_v1  ;;  %242 = vst [vmem:[#allocation2 + $0x8] sm:$0xff] %v1628_v1  ;;  %620 = vmatprep.mubr.f32.mxu0 %v1628_v1  ;;  %1318 = vmatprep.mubr.f32.mxu1 %v1628_v1  ;;  %s2471_s14 = smov 113   ;;  %s2457_s16 = smov 15   ;;  %v488_v18 = vcombine.low %v1797_v8, %v1797_v8  ;;  %v1637_v21 = vmov 0   ;;  %vm343_vm8 = vcmask 138240   ;;  %v1875_v58 = vcombine.high %v1797_v8, %v1797_v8 }
  0x37   : > { %v245_v3 = vadd.s32 128, %v244_v2  ;;  %v250_v4 = vand.u32 15, %v244_v2  ;;  %319 = vst [vmem:[#allocation2 + $0x4] sm:$0xff] %v1797_v8  ;;  %431 = vst [vmem:[#allocation3 + $0x60] sm:$0xf] %v1797_v8  ;;  %s2470_s25 = smov 111   ;;  %1521 = vset.pattern.permute.xlu0 %v1637_v21 }
  0x38   : > { %s2475_s26 = smov 127   ;;  %s1635_s28 = smov 112   ;;  %vm392_vm9 = vcmask 121856   ;;  %vm404_vm10 = vcmask 1039360   ;;  %vm496_vm11 = vcmask 916480   ;;  %vm2472_vm12 = vcmask 7168  }
  0x39   : > { %v257_v5 = vand.u32 15, %v245_v3  ;;  %v294_v6 = vadd.s32 1, %v250_v4  ;;  %v282_v7 = vadd.s32 4294967295, %v250_v4  ;;  %s1636_s8 = smov 16   ;;  %v306_v22 = vadd.s32 2, %v250_v4  ;;  %s2445_s10 = smov 34  }
  0x3a   : > { %v270_v27 = vadd.s32 4294967294, %v250_v4  ;;  %vm377_vm13 = vcmask 924672   ;;  %432 = vst [vmem:[#allocation3 + $0x28] sm:$0xf] %v1875_v58  ;;  %vm362_vm14 = vcmask 130048   ;;  %vm328_vm15 = vcmask 908288  }
  0x3b   : > { %v295_v9 = vadd.s32 1, %v257_v5  ;;  %vm298_vm0 = vcmp.lt.s32.totalorder %v294_v6, 16  ;;  %v283_v10 = vadd.s32 4294967295, %v257_v5  ;;  %vm284_vm1 = vcmp.ge.s32.totalorder %v282_v7, 0  ;;  %s2447_s11 = smov 33   ;;  %s2451_s23 = smov 30  }
  0x3c   : > { %v1432_v11 = vsel %vm298_vm0, 1.0, %v1628_v1  ;;  %v1430_v13 = vsel %vm284_vm1, 1.0, %v1628_v1  ;;  %v307_v23 = vadd.s32 2, %v257_v5  ;;  %vm310_vm4 = vcmp.lt.s32.totalorder %v306_v22, 16  ;;  %s2449_s15 = smov 31   ;;  %s2453_s17 = smov 18  }
  0x3d   : > { %vm299_vm2 = vcmp.lt.s32.totalorder %v295_v9, 16  ;;  %vm285_vm3 = vcmp.ge.s32.totalorder %v283_v10, 0  ;;  %v1522_v17 = vld [vmem:[#allocation2 + $0xc] ss:$0 sps:$4 sm:$0xff]   ;;  %v1434_v24 = vsel %vm310_vm4, 1.0, %v1628_v1  ;;  %v271_v28 = vadd.s32 4294967294, %v257_v5 }
  0x3e   : > { %v1433_v12 = vsel %vm299_vm2, 1.0, %v1628_v1  ;;  %v1431_v14 = vsel %vm285_vm3, 1.0, %v1628_v1  ;;  %v1524_v19 = vld [vmem:[#allocation2 + $0x8] ss:$0 sps:$4 sm:$0xff]   ;;  %v1828_v20 = vld [vmem:[#allocation2] sm:$0xff]  ;;  %vm311_vm5 = vcmp.lt.s32.totalorder %v307_v23, 16 }
  0x3f   : > { %v1805_v15 = vcombine.low %v1432_v11, %v1433_v12  ;;  %v1811_v16 = vcombine.low %v1430_v13, %v1431_v14  ;;  %v1435_v25 = vsel %vm311_vm5, 1.0, %v1628_v1  ;;  %vm272_vm6 = vcmp.ge.s32.totalorder %v270_v27, 0  ;;  %v504_v34 = vld [vmem:[#allocation2 + $0xc] sm:$0xf]  ;;  %v370_v39 = vld [vmem:[#allocation2 + $0x8] sm:$0xf] }
  0x40   : > { %v1834_v26 = vcombine.low %v1434_v24, %v1435_v25  ;;  %vm273_vm7 = vcmp.ge.s32.totalorder %v271_v28, 0  ;;  %v1428_v29 = vsel %vm272_vm6, 1.0, %v1628_v1  ;;  %v460_v40 = vld [vmem:[#allocation2 + $0xc] sm:$0xf]  ;;  %v321_v48 = vld [vmem:[#allocation2 + $0x8] sm:$0xf]  ;;  %v354_v25 = vcombine.low %v1828_v20, %v1828_v20 }
  0x41   : > { %435 = vrot.lane.b32.xlu1 %v1805_v15, %s2463_s29  ;;  %505 = vrot.lane.b32.xlu0 %v1805_v15, %s2455_s12  ;;  %v1429_v30 = vsel %vm273_vm7, 1.0, %v1628_v1  ;;  %v434_v0 = vld [vmem:[#allocation2 + $0xc] sm:$0xf]  ;;  %v400_v1 = vld [vmem:[#allocation2 + $0x8] sm:$0xf]  ;;  %s2461_s7 = smov 2  }
  0x42   : > { %v1838_v31 = vcombine.low %v1428_v29, %v1429_v30  ;;  %v539_v27 = vld [vmem:[%s2438_s2] sm:$0xf]  ;;  %s2459_s9 = smov 14   ;;  %vm549_vm0 = vcmask 1043456   ;;  %vm2474_vm1 = vcmask 277504   ;;  %vm2465_vm2 = vcmask 269312  }
  0x43   : > { %vm545_vm3 = vcmask 293888   ;;  %vm2466_vm4 = vcmask 252928   ;;  %vm905_vm5 = vcmask 15360   ;;  %vm2476_vm6 = vcmask 244736   ;;  %p2518_p12 = scmp.ne.s32.totalorder %s2480_s30, 0 }
  0x44   : > { %vm2467_vm7 = vcmask 146432  }
  0x45   : > { %374 = vrot.lane.b32.xlu1 %v1805_v15, %s2471_s14  ;;  %461 = vrot.lane.b32.xlu0 %v1811_v16, %s2457_s16 }
  0x49   : > { %325 = vrot.lane.b32.xlu1 %v1811_v16, %s2470_s25  ;;  %401 = vrot.lane.b32.xlu0 %v1811_v16, %s2475_s26 }
  0x4d   : > { %494 = vrot.lane.b32.xlu0 %v1522_v17, %s1635_s28  ;;  %492 = vrot.lane.b32.xlu1 %v1797_v8, %s1635_s28 }
  0x51   : > { %490 = vrot.lane.b32.xlu0 %v488_v18, %s1635_s28  ;;  %360 = vrot.lane.b32.xlu1 %v1524_v19, %s1636_s8 }
  0x55   : > { %358 = vrot.lane.b32.xlu0 %v1828_v20, %s1636_s8 }
  0xb3   : > { %v436_v32 = vpop.permute.xlu1 %435  ;;  %v506_v33 = vpop.permute.xlu0 %505 }
  0xb4   : > { %v1840_v35 = vrot.slane %v506_v33, 4  ;;  %v1863_v53 = vrot.slane %v436_v32, 4 }
  0xb6   : > { %v512_v36 = vmul.f32 %v1840_v35, %v504_v34  ;;  %v1852_v45 = vsel %vm343_vm8, %v1840_v35, %v506_v33  ;;  %v1887_v62 = vsel %vm2472_vm12, %v1863_v53, %v436_v32  ;;  %v442_v7 = vmul.f32 %v1863_v53, %v434_v0 }
  0xb7   : > { %v375_v37 = vpop.permute.xlu1 %374  ;;  %v462_v38 = vpop.permute.xlu0 %461  ;;  %v511_v51 = vmul.f32 %v1852_v45, %v1797_v8  ;;  %v441_v6 = vmul.f32 %v1887_v62, %v1797_v8 }
  0xb8   : > { %v1843_v41 = vrot.slane %v375_v37, 4  ;;  %v1845_v42 = vrot.slane %v462_v38, 4  ;;  %520 = vrot.lane.b32.xlu1 %v512_v36, %s2470_s25  ;;  %v446_v12 = vcombine.low %v442_v7, %v442_v7 }
  0xb9   : > { %v515_v14 = vcombine.high %v511_v51, %v511_v51  ;;  %v445_v22 = vcombine.low %v441_v6, %v441_v6 }
  0xba   : > { %v382_v43 = vmul.f32 %v1843_v41, %v370_v39  ;;  %v468_v44 = vmul.f32 %v1845_v42, %v460_v40  ;;  %v1867_v54 = vsel %vm392_vm9, %v1845_v42, %v462_v38  ;;  %v1891_v63 = vsel %vm377_vm13, %v1843_v41, %v375_v37 }
  0xbb   : > { %v326_v46 = vpop.permute.xlu1 %325  ;;  %v402_v47 = vpop.permute.xlu0 %401  ;;  %v467_v61 = vmul.f32 %v1867_v54, %v1797_v8  ;;  %v381_v5 = vmul.f32 %v1891_v63, %v1828_v20 }
  0xbc   : > { %v1854_v49 = vrot.slane %v326_v46, 4  ;;  %v1856_v50 = vrot.slane %v402_v47, 4  ;;  %390 = vrot.lane.b32.xlu1 %v382_v43, %s2457_s16  ;;  %476 = vrot.lane.b32.xlu0 %v468_v44, %s2471_s14 }
  0xbd   : > { %v471_v17 = vcombine.high %v467_v61, %v467_v61  ;;  %v385_v21 = vcombine.high %v381_v5, %v381_v5 }
  0xbe   : > { %v333_v52 = vmul.f32 %v1854_v49, %v321_v48  ;;  %v1871_v55 = vsel %vm404_vm10, %v1856_v50, %v402_v47  ;;  %v409_v9 = vmul.f32 %v1856_v50, %v400_v1  ;;  %v1912_v18 = vsel %vm328_vm15, %v1854_v49, %v326_v46 }
  0xbf   : > { %v495_v56 = vpop.permute.xlu0 %494  ;;  %v493_v57 = vpop.permute.xlu1 %492  ;;  %v408_v60 = vmul.f32 %v1871_v55, %v1828_v20  ;;  %v332_v19 = vmul.f32 %v1828_v20, %v1912_v18  ;;  %v1143_v20 = vld [vmem:[#allocation2 + $0xc] sm:$0xf] }
  0xc0   : > { %516 = vrot.lane.b32.xlu0 %v511_v51, %s2470_s25  ;;  %341 = vrot.lane.b32.xlu1 %v333_v52, %s2455_s12  ;;  %v498_v59 = vsel %vm496_vm11, %v493_v57, %v495_v56  ;;  %v413_v13 = vcombine.low %v409_v9, %v409_v9 }
  0xc1   : > { %502 = vst [vmem:[#allocation3 + $0x78] sm:$0xf0] %v498_v59  ;;  %v412_v23 = vcombine.low %v408_v60, %v408_v60  ;;  %v336_v24 = vcombine.high %v332_v19, %v332_v19 }
  0xc3   : > { %v491_v2 = vpop.permute.xlu0 %490  ;;  %v361_v4 = vpop.permute.xlu1 %360 }
  0xc4   : > { %416 = vrot.lane.b32.xlu0 %v408_v60, %s2463_s29  ;;  %472 = vrot.lane.b32.xlu1 %v467_v61, %s2471_s14  ;;  %v497_v3 = vsel %vm496_vm11, %v491_v2, %v493_v57 }
  0xc5   : > { %501 = vst [vmem:[#allocation3 + $0x40] sm:$0xf0] %v497_v3 }
  0xc7   : > { %v1902_v10 = vpop.permute.xlu0 %358 }
  0xc8   : > { %386 = vrot.lane.b32.xlu0 %v381_v5, %s2457_s16  ;;  %449 = vrot.lane.b32.xlu1 %v441_v6, %s2475_s26  ;;  %v364_v11 = vsel %vm362_vm14, %v1902_v10, %v361_v4 }
  0xc9   : > { %368 = vst [vmem:[#allocation3] sm:$0xf0] %v364_v11 }
  0xcc   : > { %451 = vrot.lane.b32.xlu0 %v446_v12, %s2475_s26  ;;  %418 = vrot.lane.b32.xlu1 %v413_v13, %s2463_s29 }
  0xd0   : > { %518 = vrot.lane.b32.xlu0 %v515_v14, %s2470_s25  ;;  %474 = vrot.lane.b32.xlu1 %v471_v17, %s2471_s14  ;;  %v1187_v14 = vld [vmem:[#allocation2 + $0xc] sm:$0xf] }
  0xd4   : > { %388 = vrot.lane.b32.xlu0 %v385_v21, %s2457_s16  ;;  %447 = vrot.lane.b32.xlu1 %v445_v22, %s2475_s26  ;;  %s1651_s16 = smov 97  }
  0xd8   : > { %414 = vrot.lane.b32.xlu1 %v412_v23, %s2463_s29  ;;  %339 = vrot.lane.b32.xlu0 %v336_v24, %s2455_s12  ;;  %v1161_v24 = vld [vmem:[#allocation2 + $0xc] sm:$0xf]  ;;  %s1653_s29 = smov 32  }
  0xdc   : > { %356 = vrot.lane.b32.xlu1 %v354_v25, %s1636_s8  ;;  %337 = vrot.lane.b32.xlu0 %v332_v19, %s2455_s12  ;;  %s2468_s12 = smov 98  }
  0xe0   : > { %542 = vperm.xlu0 %1521, %v539_v27   ;;  %1188 = vrot.lane.b32.xlu1 %v1834_v26, %s2445_s10  ;;  %s2473_s10 = smov 114   ;;  %v528_v27 = vld [vmem:[%s2437_s1] sm:$0xf] }
  0xe4   : > { %1162 = vrot.lane.b32.xlu1 %v1805_v15, %s2447_s11  ;;  %1093 = vrot.lane.b32.xlu0 %v1838_v31, %s2451_s23  ;;  %s1646_s11 = smov 110   ;;  %s1648_s23 = smov 126  }
  0xe8   : > { %1118 = vrot.lane.b32.xlu1 %v1811_v16, %s2449_s15  ;;  %1067 = vrot.lane.b32.xlu0 %v1834_v26, %s2453_s17  ;;  %s1647_s15 = smov 94   ;;  %s1649_s17 = smov 96  }
  0xec   : > { %960 = vrot.lane.b32.xlu1 %v1834_v26, %s2461_s7  ;;  %985 = vrot.lane.b32.xlu0 %v1838_v31, %s2459_s9  ;;  %s1652_s9 = smov 95   ;;  %s2488_s7 = smov 14  }
  0xf0   : > { %859 = vrot.lane.b32.xlu0 %v1834_v26, %s2473_s10  ;;  %887 = vrot.lane.b32.xlu1 %v1838_v31, %s1648_s23 }
  0xf4   : > { %775 = vrot.lane.b32.xlu0 %v1838_v31, %s1646_s11  ;;  %748 = vrot.lane.b32.xlu1 %v1834_v26, %s2468_s12 }
  0xf8   : > { %644 = vrot.lane.b32.xlu0 %v1838_v31, %s1647_s15  ;;  %717 = vrot.lane.b32.xlu1 %v1805_v15, %s1651_s16 }
  0xfc   : > { %1151 = vrot.lane.b32.xlu0 %v1143_v20, %s1649_s17  ;;  %671 = vrot.lane.b32.xlu1 %v1811_v16, %s1652_s9 }
 0x12a   : > { %v521_v28 = vpop.permute.xlu1 %520 }
 0x12e   : > { %v391_v29 = vpop.permute.xlu1 %390  ;;  %v477_v30 = vpop.permute.xlu0 %476 }
 0x132   : > { %v517_v32 = vpop.permute.xlu0 %516  ;;  %v342_v31 = vpop.permute.xlu1 %341 }
 0x136   : > { %v417_v33 = vpop.permute.xlu0 %416  ;;  %v473_v34 = vpop.permute.xlu1 %472 }
 0x13a   : > { %v387_v36 = vpop.permute.xlu0 %386  ;;  %v450_v37 = vpop.permute.xlu1 %449 }
 0x13e   : > { %v452_v38 = vpop.permute.xlu0 %451  ;;  %v419_v39 = vpop.permute.xlu1 %418 }
 0x13f   : > { %v454_v26 = vsel %vm404_vm10, %v450_v37, %v452_v38  ;;  %v422_v40 = vsel %vm2472_vm12, %v417_v33, %v419_v39  ;;  %v1092_v39 = vld [vmem:[#allocation2 + $0xc] sm:$0xf] }
 0x140   : > { %458 = vst [vmem:[#allocation3 + $0x28] sm:$0xf0] %v454_v26  ;;  %426 = vst [vmem:[#allocation3 + $0x48] sm:$0xf0] %v422_v40 }
 0x142   : > { %v519_v15 = vpop.permute.xlu0 %518  ;;  %v475_v43 = vpop.permute.xlu1 %474 }
 0x143   : > { %v522_v16 = vsel %vm328_vm15, %v517_v32, %v519_v15  ;;  %v523_v44 = vsel %vm328_vm15, %v519_v15, %v521_v28  ;;  %v478_v46 = vsel %vm377_vm13, %v473_v34, %v475_v43  ;;  %v479_v47 = vsel %vm377_vm13, %v475_v43, %v477_v30 }
 0x144   : > { %526 = vst [vmem:[#allocation3 + $0x80] sm:$0xf] %v522_v16  ;;  %527 = vst [vmem:[#allocation3 + $0xa8] sm:$0xf] %v523_v44 }
 0x145   : > { %482 = vst [vmem:[#allocation3 + $0x40] sm:$0xf] %v478_v46  ;;  %483 = vst [vmem:[#allocation3 + $0x78] sm:$0xf] %v479_v47 }
 0x146   : > { %v389_v48 = vpop.permute.xlu0 %388  ;;  %v448_v51 = vpop.permute.xlu1 %447 }
 0x147   : > { %v393_v52 = vsel %vm392_vm9, %v387_v36, %v389_v48  ;;  %v394_v56 = vsel %vm392_vm9, %v389_v48, %v391_v29  ;;  %v453_v57 = vsel %vm404_vm10, %v448_v51, %v450_v37  ;;  %v534_v11 = vld [vmem:[#allocation3 + $0x28] sm:$0xff]  ;;  %v1117_v36 = vld [vmem:[#allocation2 + $0xc] sm:$0xf] }
 0x148   : > { %397 = vst [vmem:[#allocation3 + $0x10] sm:$0xf] %v393_v52  ;;  %398 = vst [vmem:[#allocation3 + $0x48] sm:$0xf] %v394_v56  ;;  %v1066_v52 = vld [vmem:[#allocation2 + $0xc] sm:$0xf] }
 0x149   : > { %457 = vst [vmem:[#allocation3 + $0x60] sm:$0xf0] %v453_v57  ;;  %v1047_v57 = vld [vmem:[#allocation2 + $0xc] sm:$0xf] }
 0x14a   : > { %v415_v59 = vpop.permute.xlu1 %414  ;;  %v340_v60 = vpop.permute.xlu0 %339 }
 0x14b   : > { %v421_v61 = vsel %vm2472_vm12, %v415_v59, %v417_v33  ;;  %v345_v0 = vsel %vm343_vm8, %v340_v60, %v342_v31  ;;  %v538_v1 = vld [vmem:[#allocation3 + $0xa8] sm:$0xf]  ;;  %v537_v2 = vld [vmem:[#allocation3 + $0x80] sm:$0xf]  ;;  %vm720_vm12 = vcmask 793600  }
 0x14c   : > { %425 = vst [vmem:[#allocation3 + $0x10] sm:$0xf0] %v421_v61  ;;  %349 = vst [vmem:[#allocation3] sm:$0xf] %v345_v0  ;;  %1436 = vmatprep.subr.msk.mxu0 %vm549_vm0, %v538_v1  ;;  %v536_v3 = vld [vmem:[#allocation3 + $0x78] sm:$0xff]  ;;  %v535_v6 = vld [vmem:[#allocation3 + $0x40] sm:$0xff]  ;;  %v1049_v0 = vmul.f32 %v1047_v57, %v1840_v35 }
 0x14d   : > { %1437 = vmatpush1.msk.msra.mxu0 %vm549_vm0, %v537_v2 }
 0x14e   : > { %580 = vmatprep.subr.mxu0 %v536_v3  ;;  %v357_v4 = vpop.permute.xlu1 %356  ;;  %v338_v5 = vpop.permute.xlu0 %337  ;;  %v1010_v3 = vld [vmem:[#allocation2 + $0xc] sm:$0xf] }
 0x14f   : > { %v363_v7 = vsel %vm362_vm14, %v357_v4, %v1902_v10  ;;  %v344_v9 = vsel %vm343_vm8, %v338_v5, %v340_v60  ;;  %581 = vmatpush1.msra.mxu0 %v535_v6  ;;  %v532_v13 = vld [vmem:[#allocation3 + $0x48] sm:$0xff]  ;;  %v1012_v4 = vmul.f32 %v1010_v3, %v1845_v42  ;;  %v1527_v5 = vld [vmem:[#allocation2 + $0xc] ss:$0 sps:$4 sm:$0xff]  }
 0x150   : > { %v533_v12 = vld [vmem:[#allocation3 + $0x60] sm:$0xff]  ;;  %367 = vst [vmem:[#allocation3 + $0xb0] sm:$0xf0] %v363_v7  ;;  %348 = vst [vmem:[#allocation3 + $0xb0] sm:$0xf] %v344_v9  ;;  %582 = vmatprep.subr.mxu0 %v534_v11 }
 0x151   : > { %583 = vmatpush1.msra.mxu0 %v533_v12  ;;  %v959_v6 = vld [vmem:[#allocation2 + $0xc] sm:$0xf] }
 0x152   : > { %584 = vmatprep.subr.mxu0 %v532_v13  ;;  %v1189_v17 = vpop.permute.xlu1 %1188  ;;  %v984_v7 = vld [vmem:[#allocation2 + $0xc] sm:$0xf] }
 0x153   : > { %v531_v19 = vld [vmem:[#allocation3 + $0x10] sm:$0xff]  ;;  %v1190_v21 = vrot.slane %v1189_v17, 4  ;;  %v530_v22 = vld [vmem:[#allocation3] sm:$0xff]  ;;  %v939_v11 = vld [vmem:[#allocation2 + $0xc] sm:$0xf] }
 0x154   : > { %585 = vmatpush1.msra.mxu0 %v531_v19  ;;  %v941_v13 = vmul.f32 %v939_v11, %v1863_v53 }
 0x155   : > { %v1975_v10 = vsel %vm2474_vm1, %v1190_v21, %v1189_v17  ;;  %v1195_v23 = vmul.f32 %v1190_v21, %v1187_v14  ;;  %586 = vmatprep.subr.mxu0 %v530_v22  ;;  %vm674_vm1 = vcmask 777216  }
 0x156   : > { %v1163_v25 = vpop.permute.xlu1 %1162  ;;  %v945_v14 = vcombine.low %v941_v13, %v941_v13 }
 0x157   : > { %v529_v20 = vld [vmem:[#allocation3 + $0xb0] sm:$0xff]  ;;  %v1164_v28 = vrot.slane %v1163_v25, 4  ;;  %1203 = vrot.lane.b32.xlu1 %v1195_v23, %s1647_s15 }
 0x158   : > { %587 = vmatpush1.msra.mxu0 %v529_v20 }
 0x159   : > { %v1982_v29 = vsel %vm2465_vm2, %v1164_v28, %v1163_v25  ;;  %v1169_v30 = vmul.f32 %v1164_v28, %v1161_v24  ;;  %1438 = vmatmul.mubr.msk.f32.vlgmr.msra.gmra.mxu0 %vm545_vm3, %v528_v27  ;;  %vm2469_vm3 = vcmask 113664   ;;  %vm2477_vm2 = vcmask 1031168  }
 0x15a   : > { %v1119_v32 = vpop.permute.xlu1 %1118 }
 0x15b   : > { %v543_v31 = vpop.permute.xlu0 %542  ;;  %v1173_v33 = vcombine.low %v1169_v30, %v1169_v30  ;;  %v1120_v34 = vrot.slane %v1119_v32, 4 }
 0x15d   : > { %1178 = vrot.lane.b32.xlu0 %v1173_v33, %s1652_s9  ;;  %v1986_v37 = vsel %vm2466_vm4, %v1120_v34, %v1119_v32  ;;  %v1125_v43 = vmul.f32 %v1120_v34, %v1117_v36  ;;  %vm862_vm4 = vcmask 932864  }
 0x15e   : > { %v961_v38 = vpop.permute.xlu1 %960 }
 0x15f   : > { %v1094_v26 = vpop.permute.xlu0 %1093  ;;  %v962_v40 = vrot.slane %v961_v38, 4  ;;  %v1129_v48 = vcombine.low %v1125_v43, %v1125_v43 }
 0x160   : > { %v1095_v15 = vrot.slane %v1094_v26, 4 }
 0x161   : > { %v1989_v16 = vsel %vm905_vm5, %v962_v40, %v961_v38  ;;  %v967_v9 = vmul.f32 %v962_v40, %v959_v6 }
 0x162   : > { %v1992_v44 = vsel %vm2476_vm6, %v1095_v15, %v1094_v26  ;;  %v1100_v46 = vmul.f32 %v1095_v15, %v1092_v39  ;;  %v888_v30 = vpop.permute.xlu1 %887  ;;  %vm647_vm6 = vcmask 769024  }
 0x163   : > { %v1068_v47 = vpop.permute.xlu0 %1067 }
 0x164   : > { %1108 = vrot.lane.b32.xlu0 %v1100_v46, %s2468_s12  ;;  %v1069_v51 = vrot.slane %v1068_v47, 4 }
 0x166   : > { %v1996_v56 = vsel %vm2467_vm7, %v1069_v51, %v1068_v47  ;;  %v1074_v60 = vmul.f32 %v1069_v51, %v1066_v52  ;;  %vm778_vm7 = vcmask 900096   ;;  %v749_v46 = vpop.permute.xlu1 %748 }
 0x167   : > { %v986_v59 = vpop.permute.xlu0 %985 }
 0x168   : > { %1134 = vrot.lane.b32.xlu0 %v1129_v48, %s1651_s16  ;;  %v987_v61 = vrot.slane %v986_v59, 4  ;;  %v1078_v2 = vcombine.low %v1074_v60, %v1074_v60  ;;  %v750_v48 = vrot.slane %v749_v46, 4 }
 0x16a   : > { %v2001_v1 = vsel %vm2469_vm3, %v987_v61, %v986_v59  ;;  %v992_v35 = vmul.f32 %v987_v61, %v984_v7  ;;  %vm751_vm3 = vcmask 801792  }
 0x16b   : > { %v752_v52 = vsel %vm751_vm3, %v750_v48, %v749_v46 }
 0x16c   : > { %1057 = vrot.lane.b32.xlu0 %v1049_v0, %s2470_s25  ;;  %v996_v12 = vcombine.low %v992_v35, %v992_v35 }
 0x170   : > { %1083 = vrot.lane.b32.xlu0 %v1078_v2, %s1646_s11 }
 0x174   : > { %1020 = vrot.lane.b32.xlu0 %v1012_v4, %s2471_s14 }
 0x178   : > { %1038 = vrot.lane.b32.xlu0 %v1527_v5, %s1635_s28 }
 0x17c   : > { %975 = vrot.lane.b32.xlu0 %v967_v9, %s1648_s23 }
 0x180   : > { %1001 = vrot.lane.b32.xlu0 %v996_v12, %s2473_s10 }
 0x184   : > { %950 = vrot.lane.b32.xlu0 %v945_v14, %s2475_s26 }
 0x219   : > { %v622_v42 = vpop.f32.mrf.mxu0 }
 0x21a   : > { %v623_v17 = vadd.f32 %v622_v42, %v543_v31 }
 0x21b   : > { %v624_v19 = vpop.f32.mrf.mxu0 }
 0x21c   : > { %v627_v21 = vmax.f32 %v623_v17, 0.0  ;;  %v625_v22 = vadd.f32 %v624_v19, %v543_v31  ;;  %v889_v31 = vrot.slane %v888_v30, 4 }
 0x21e   : > { %v628_v23 = vmax.f32 %v625_v22, 0.0  ;;  %v2013_v24 = vadd.f32 %v627_v21, %v1797_v8  ;;  %v891_v36 = vsel %vm2477_vm2, %v889_v31, %v888_v30  ;;  %vm1153_vm2 = vcmask 785408  }
 0x220   : > { %v2016_v25 = vadd.f32 %v628_v23, %v1875_v58  ;;  %v1532_v32 = vcombine.low %v2013_v24, %v2013_v24 }
 0x222   : > { %v2020_v53 = vcombine.low %v2013_v24, %v2016_v25  ;;  %v1531_v27 = vcombine.low %v2016_v25, %v2016_v25 }
 0x224   : > { %638 = vst [vmem:[#allocation2 + $0x4] sm:$0xff] %v2020_v53  ;;  %1147 = vrot.lane.b32.xlu1 %v2020_v53, %s1649_s17  ;;  %936 = vst [vmem:[#allocation3 + $0x88] sm:$0xf] %v2020_v53  ;;  %v2039_v20 = vmul.f32 %v1975_v10, %v2020_v53  ;;  %v2044_v28 = vmul.f32 %v1982_v29, %v2020_v53  ;;  %v2054_v10 = vmul.f32 %v1986_v37, %v2020_v53  ;;  %v2057_v29 = vpop.permute.xlu0 %859 }
 0x225   : > { %937 = vst [vmem:[#allocation3 + $0x70] sm:$0xf] %v1531_v27  ;;  %v861_v34 = vrot.slane %v2057_v29, 4  ;;  %v2069_v37 = vmul.f32 %v1992_v44, %v2020_v53  ;;  %v2084_v39 = vmul.f32 %v1996_v56, %v2020_v53  ;;  %v2097_v40 = vmul.f32 %v2020_v53, %v1852_v45 }
 0x226   : > { %v2112_v45 = vmul.f32 %v2020_v53, %v1867_v54  ;;  %v991_v51 = vmul.f32 %v2001_v1, %v2020_v53  ;;  %v2137_v56 = vmul.f32 %v1989_v16, %v2020_v53  ;;  %v2153_v16 = vmul.f32 %v2020_v53, %v1887_v62 }
 0x227   : > { %v1198_v13 = vcombine.high %v2039_v20, %v2039_v20  ;;  %v1172_v42 = vcombine.low %v2044_v28, %v2044_v28  ;;  %v1128_v21 = vcombine.low %v2054_v10, %v2054_v10  ;;  %v1103_v30 = vcombine.high %v2069_v37, %v2069_v37 }
 0x228   : > { %1036 = vrot.lane.b32.xlu1 %v2020_v53, %s1635_s28  ;;  %v2099_v15 = vpop.permute.xlu0 %775 }
 0x229   : > { %v777_v44 = vrot.slane %v2099_v15, 4 }
 0x22b   : > { %v2030_v8 = vld [vmem:[#allocation2] sm:$0xff]  ;;  %v698_v58 = vld [vmem:[#allocation2 + $0x8] sm:$0xf] }
 0x22c   : > { %828 = vrot.lane.b32.xlu0 %v2030_v8, %s1636_s8  ;;  %706 = vrot.lane.b32.xlu1 %v698_v58, %s1653_s29  ;;  %v2061_v33 = vmul.f32 %v2030_v8, %v1871_v55  ;;  %v2074_v38 = vmul.f32 %v891_v36, %v2030_v8  ;;  %v863_v55 = vsel %vm862_vm4, %v861_v34, %v2057_v29  ;;  %v886_v61 = vld [vmem:[#allocation2 + $0x8] sm:$0xf]  ;;  %v645_v3 = vpop.permute.xlu0 %644 }
 0x22d   : > { %v2089_v26 = vmul.f32 %v2030_v8, %v863_v55  ;;  %v2103_v43 = vmul.f32 %v2030_v8, %v1891_v63  ;;  %v2116_v47 = vmul.f32 %v2030_v8, %v1912_v18  ;;  %v779_v63 = vsel %vm778_vm7, %v777_v44, %v2099_v15  ;;  %v2131_v18 = vpop.permute.xlu1 %717  ;;  %v839_v62 = vld [vmem:[#allocation2 + $0x8] sm:$0xf] }
 0x22e   : > { %v2129_v54 = vmul.f32 %v2030_v8, %v779_v63  ;;  %v2142_v57 = vmul.f32 %v2030_v8, %v752_v52  ;;  %v719_v59 = vrot.slane %v2131_v18, 4  ;;  %v701_v0 = vcombine.high %v2030_v8, %v2030_v8  ;;  %v802_v9 = vld [vmem:[#allocation2 + $0x8] sm:$0xf] }
 0x22f   : > { %v895_v4 = vmul.f32 %v889_v31, %v886_v61  ;;  %v841_v7 = vmul.f32 %v839_v62, %v1843_v41  ;;  %v804_v12 = vmul.f32 %v802_v9, %v1854_v49  ;;  %v1530_v41 = vld [vmem:[#allocation2 + $0x8] ss:$0 sps:$4 sm:$0xff]   ;;  %v824_v17 = vcombine.low %v2030_v8, %v2030_v8 }
 0x230   : > { %702 = vrot.lane.b32.xlu0 %v2030_v8, %s1653_s29  ;;  %1149 = vrot.lane.b32.xlu1 %v1531_v27, %s1649_s17  ;;  %s2486_s17 = smov 1   ;;  %v721_v1 = vsel %vm720_vm12, %v719_v59, %v2131_v18  ;;  %v2176_v35 = vpop.permute.xlu0 %1151  ;;  %v744_v49 = vld [vmem:[#allocation2 + $0x8] sm:$0xf]  ;;  %v646_v22 = vrot.slane %v645_v3, 4  ;;  %v1077_v27 = vcombine.low %v2084_v39, %v2084_v39  ;;  %v898_v31 = vcombine.high %v2074_v38, %v2074_v38 }
 0x231   : > { %v2147_v60 = vpop.permute.xlu1 %671  ;;  %v2166_v5 = vmul.f32 %v2030_v8, %v721_v1  ;;  %v756_v23 = vmul.f32 %v750_v48, %v744_v49  ;;  %v640_v53 = vld [vmem:[#allocation2 + $0x8] sm:$0xf]  ;;  %v844_v36 = vcombine.high %v2103_v43, %v2103_v43  ;;  %v759_v63 = vcombine.high %v2142_v57, %v2142_v57 }
 0x232   : > { %v673_v2 = vrot.slane %v2147_v60, 4  ;;  %v858_v61 = vld [vmem:[#allocation2 + $0x8] sm:$0xf]  ;;  %v786_v15 = vcombine.low %v2129_v54, %v2129_v54 }
 0x233   : > { %v774_v1 = vld [vmem:[#allocation2 + $0x8] sm:$0xf]  ;;  %v728_v49 = vcombine.low %v2166_v5, %v2166_v5 }
 0x234   : > { %1199 = vrot.lane.b32.xlu0 %v2039_v20, %s1647_s15  ;;  %1176 = vrot.lane.b32.xlu1 %v2044_v28, %s1652_s9  ;;  %v675_v6 = vsel %vm674_vm1, %v673_v2, %v2147_v60  ;;  %v2188_v14 = vpop.permute.xlu0 %1178  ;;  %v652_v20 = vmul.f32 %v646_v22, %v640_v53  ;;  %v995_v28 = vcombine.low %v991_v51, %v991_v51 }
 0x235   : > { %v2179_v11 = vmul.f32 %v2030_v8, %v675_v6  ;;  %v716_v6 = vld [vmem:[#allocation2 + $0x8] sm:$0xf] }
 0x238   : > { %1034 = vrot.lane.b32.xlu0 %v1532_v32, %s1635_s28  ;;  %1132 = vrot.lane.b32.xlu1 %v2054_v10, %s1651_s16  ;;  %s2487_s28 = smov 2   ;;  %v2197_v19 = vpop.permute.xlu0 %1108  ;;  %v1052_v10 = vcombine.high %v2097_v40, %v2097_v40 }
 0x23c   : > { %922 = vrot.lane.b32.xlu0 %v2061_v33, %s2486_s17  ;;  %1104 = vrot.lane.b32.xlu1 %v2069_v37, %s2468_s12  ;;  %s2489_s12 = smov 15   ;;  %v2206_v58 = vpop.permute.xlu0 %1134  ;;  %v1015_v37 = vcombine.high %v2112_v45, %v2112_v45 }
 0x240   : > { %899 = vrot.lane.b32.xlu0 %v2074_v38, %s2487_s28  ;;  %1081 = vrot.lane.b32.xlu1 %v2084_v39, %s1646_s11  ;;  %v2213_v32 = vpop.permute.xlu0 %1057  ;;  %v807_v38 = vcombine.high %v2116_v47, %v2116_v47  ;;  %v648_v39 = vsel %vm647_vm6, %v646_v22, %v645_v3  ;;  %v2260_v3 = vpop.permute.xlu1 %1203 }
 0x244   : > { %874 = vrot.lane.b32.xlu0 %v2089_v26, %s2488_s7  ;;  %1053 = vrot.lane.b32.xlu1 %v2097_v40, %s2470_s25  ;;  %s2490_s25 = smov 17   ;;  %v2224_v55 = vpop.permute.xlu0 %1083  ;;  %v970_v40 = vcombine.high %v2137_v56, %v2137_v56 }
 0x248   : > { %845 = vrot.lane.b32.xlu0 %v2103_v43, %s2489_s12  ;;  %1016 = vrot.lane.b32.xlu1 %v2112_v45, %s2471_s14  ;;  %s2491_s14 = smov 18   ;;  %v913_v43 = vld [vmem:[#allocation2 + $0x8] sm:$0xf]  ;;  %v2236_v46 = vpop.permute.xlu0 %1020  ;;  %v651_v45 = vmul.f32 %v2030_v8, %v648_v39  ;;  %v867_v8 = vmul.f32 %v861_v34, %v858_v61  ;;  %v870_v34 = vcombine.low %v2089_v26, %v2089_v26 }
 0x249   : > { %v915_v48 = vmul.f32 %v913_v43, %v1856_v50  ;;  %v1238_v50 = vld [vmem:[%s2440_s4] sm:$0xf] }
 0x24c   : > { %808 = vrot.lane.b32.xlu0 %v2116_v47, %s2490_s25  ;;  %999 = vrot.lane.b32.xlu1 %v991_v51, %s2473_s10  ;;  %s2492_s10 = smov 30   ;;  %v944_v47 = vcombine.low %v2153_v16, %v2153_v16  ;;  %v655_v51 = vcombine.high %v651_v45, %v651_v45  ;;  %v1039_v52 = vpop.permute.xlu0 %1038 }
 0x250   : > { %790 = vrot.lane.b32.xlu0 %v2129_v54, %s2491_s14  ;;  %971 = vrot.lane.b32.xlu1 %v2137_v56, %s1648_s23  ;;  %v919_v56 = vcombine.low %v915_v48, %v915_v48 }
 0x254   : > { %760 = vrot.lane.b32.xlu0 %v2142_v57, %s2492_s10  ;;  %948 = vrot.lane.b32.xlu1 %v2153_v16, %s2475_s26  ;;  %s2493_s26 = smov 31   ;;  %v918_v57 = vcombine.low %v2061_v33, %v2061_v33  ;;  %v2257_v16 = vpop.permute.xlu0 %975  ;;  %v783_v33 = vmul.f32 %v777_v44, %v774_v1 }
 0x256   : > { %v787_v62 = vcombine.low %v783_v33, %v783_v33 }
 0x258   : > { %704 = vrot.lane.b32.xlu0 %v701_v0, %s1653_s29  ;;  %903 = vrot.lane.b32.xlu1 %v895_v4, %s2487_s28  ;;  %s2494_s29 = smov 33   ;;  %v871_v0 = vcombine.low %v867_v8, %v867_v8  ;;  %v1002_v29 = vpop.permute.xlu0 %1001 }
 0x25c   : > { %732 = vrot.lane.b32.xlu0 %v2166_v5, %s2493_s26  ;;  %849 = vrot.lane.b32.xlu1 %v841_v7, %s2489_s12  ;;  %v951_v7 = vpop.permute.xlu0 %950 }
 0x260   : > { %686 = vrot.lane.b32.xlu0 %v2179_v11, %s2494_s29  ;;  %812 = vrot.lane.b32.xlu1 %v804_v12, %s2490_s25 }
 0x264   : > { %1201 = vrot.lane.b32.xlu0 %v1198_v13, %s1647_s15  ;;  %830 = vrot.lane.b32.xlu1 %v1530_v41, %s1636_s8  ;;  %s2495_s15 = smov 34   ;;  %v725_v13 = vmul.f32 %v719_v59, %v716_v6 }
 0x266   : > { %v729_v26 = vcombine.low %v725_v13, %v725_v13 }
 0x268   : > { %1174 = vrot.lane.b32.xlu0 %v1172_v42, %s1652_s9  ;;  %826 = vrot.lane.b32.xlu1 %v824_v17, %s1636_s8  ;;  %s2496_s9 = smov 114   ;;  %s2498_s8 = smov 111   ;;  %v670_v42 = vld [vmem:[#allocation2 + $0x8] sm:$0xf] }
 0x269   : > { %v679_v18 = vmul.f32 %v673_v2, %v670_v42  ;;  %v682_v2 = vcombine.low %v2179_v11, %v2179_v11 }
 0x26c   : > { %1130 = vrot.lane.b32.xlu0 %v1128_v21, %s1651_s16  ;;  %764 = vrot.lane.b32.xlu1 %v756_v23, %s2492_s10  ;;  %s2497_s16 = smov 98   ;;  %v683_v23 = vcombine.low %v679_v18, %v679_v18 }
 0x270   : > { %1079 = vrot.lane.b32.xlu0 %v1077_v27, %s1646_s11  ;;  %660 = vrot.lane.b32.xlu1 %v652_v20, %s2495_s15  ;;  %s2499_s11 = smov 113  }
 0x274   : > { %997 = vrot.lane.b32.xlu0 %v995_v28, %s2496_s9  ;;  %1106 = vrot.lane.b32.xlu1 %v1103_v30, %s2497_s16  ;;  %s1335_s16 = scalar_lea.sflag [#allocation6], %s1783_s13 }
 0x278   : > { %901 = vrot.lane.b32.xlu0 %v898_v31, %s2487_s28  ;;  %1055 = vrot.lane.b32.xlu1 %v1052_v10, %s2498_s8 }
 0x27c   : > { %847 = vrot.lane.b32.xlu0 %v844_v36, %s2489_s12  ;;  %1018 = vrot.lane.b32.xlu1 %v1015_v37, %s2499_s11  ;;  %s2500_s12 = smov 127  }
 0x280   : > { %810 = vrot.lane.b32.xlu0 %v807_v38, %s2490_s25  ;;  %973 = vrot.lane.b32.xlu1 %v970_v40, %s1648_s23  ;;  %s1448_s23 = sshll.u32 %s1706_s22, 7  ;;  %s1654_s22 = smov [#allocation7]  }
 0x281   : > { %s1347_s9 = scalar_lea.hbm %s2441_s5, %s1448_s23  ;;  %s1565_s11 = sshll.u32 %s1654_s22, 4  ;;  %s1566_s11 = int_to_ptr.vmem [resolvable:$false] %s1565_s11 }
 0x284   : > { %762 = vrot.lane.b32.xlu0 %v759_v63, %s2492_s10  ;;  %946 = vrot.lane.b32.xlu1 %v944_v47, %s2500_s12  ;;  %s1567_s12 = scalar_lea.vmem %s1566_s11, 256 }
 0x288   : > { %658 = vrot.lane.b32.xlu0 %v655_v51, %s2495_s15  ;;  %924 = vrot.lane.b32.xlu1 %v919_v56, %s2486_s17 }
 0x28c   : > { %656 = vrot.lane.b32.xlu0 %v651_v45, %s2495_s15  ;;  %920 = vrot.lane.b32.xlu1 %v918_v57, %s2486_s17  ;;  %s2517_s17 = sshll.u32 %s1783_s13, 3 }
 0x28d   : > { %s240_s28 = scalar_lea.vmem [#allocation7], %s2517_s17 }
 0x290   : > { %1241 = vperm.xlu0 %1521, %v1238_v50   ;;  %876 = vrot.lane.b32.xlu1 %v871_v0, %s2488_s7 }
 0x294   : > { %872 = vrot.lane.b32.xlu1 %v870_v34, %s2488_s7  ;;  %s1349_s7 = sshll.u32 %s240_s28, 4  ;;  %s1350_s7 = int_to_ptr.vmem [resolvable:$true] %s1349_s7 }
 0x295   : > { %s1561_s8 = scalar_lea.vmem %s1350_s7, 128  ;;  %p1568_p3 = scmp.lt.s32.totalorder %s1350_s7, %s1566_s11 }
 0x296   : > { %v1148_v4 = vpop.permute.xlu1 %1147  ;;  %p1562_p11 = scmp.ne.s32.totalorder %s1350_s7, %s1561_s8  ;;  %p1569_p5 = scmp.lt.s32.totalorder %s1567_s12, %s1561_s8 }
 0x298   : > { %792 = vrot.lane.b32.xlu1 %v787_v62, %s2491_s14  ;;  %p1563_p13 = pnand %p1562_p11, %p2518_p12  ;;  %p1570_p8 = por %p1569_p5, %p1568_p3 }
 0x29a   : > { %v1037_v9 = vpop.permute.xlu1 %1036  ;;  %p1564_p1 = pneg %p1563_p13 }
 0x29b   : > { %v1041_v12 = vsel %vm496_vm11, %v1037_v9, %v1039_v52 }
 0x29c   : > { %1045 = vst [vmem:[#allocation3 + $0xb8] sm:$0xf0] %v1041_v12  ;;  %788 = vrot.lane.b32.xlu1 %v786_v15, %s2491_s14  ;;  %p1571_p10 = pnand %p1570_p8, %p1564_p1 }
 0x29e   : > { %v2274_v44 = vpop.permute.xlu0 %828  ;;  %v707_v41 = vpop.permute.xlu1 %706 }
 0x2a0   : > { %734 = vrot.lane.b32.xlu1 %v729_v26, %s2493_s26 }
 0x2a2   : > { %v703_v17 = vpop.permute.xlu0 %702  ;;  %v1150_v59 = vpop.permute.xlu1 %1149 }
 0x2a3   : > { %v1154_v54 = vsel %vm1153_vm2, %v1148_v4, %v1150_v59  ;;  %v1155_v21 = vsel %vm1153_vm2, %v1150_v59, %v2176_v35 }
 0x2a4   : > { %1158 = vst [vmem:[#allocation3 + $0x98] sm:$0xf] %v1154_v54  ;;  %1159 = vst [vmem:[#allocation3 + $0x18] sm:$0xf] %v1155_v21  ;;  %730 = vrot.lane.b32.xlu1 %v728_v49, %s2493_s26 }
 0x2a6   : > { %v1200_v22 = vpop.permute.xlu0 %1199  ;;  %v1177_v53 = vpop.permute.xlu1 %1176 }
 0x2a7   : > { %v1181_v27 = vsel %vm674_vm1, %v1177_v53, %v2188_v14 }
 0x2a8   : > { %1185 = vst [vmem:[#allocation3 + $0x18] sm:$0xf0] %v1181_v27  ;;  %688 = vrot.lane.b32.xlu1 %v683_v23, %s2494_s29 }
 0x2aa   : > { %v1035_v20 = vpop.permute.xlu0 %1034  ;;  %v1133_v5 = vpop.permute.xlu1 %1132 }
 0x2ab   : > { %v1040_v60 = vsel %vm496_vm11, %v1035_v20, %v1037_v9  ;;  %v1137_v35 = vsel %vm720_vm12, %v1133_v5, %v2206_v58  ;;  %vm708_vm11 = vcmask 261120  }
 0x2ac   : > { %1044 = vst [vmem:[#allocation3 + $0x20] sm:$0xf0] %v1040_v60  ;;  %1141 = vst [vmem:[#allocation3 + $0x90] sm:$0xf0] %v1137_v35  ;;  %684 = vrot.lane.b32.xlu1 %v682_v2, %s2494_s29 }
 0x2ae   : > { %v2292_v28 = vpop.permute.xlu0 %922  ;;  %v2295_v14 = vpop.permute.xlu1 %1104 }
 0x2af   : > { %v1235_v26 = vld [vmem:[#allocation3 + $0x18] sm:$0xff] }
 0x2b2   : > { %v2297_v30 = vpop.permute.xlu0 %899  ;;  %v1082_v31 = vpop.permute.xlu1 %1081 }
 0x2b3   : > { %v1086_v10 = vsel %vm778_vm7, %v1082_v31, %v2224_v55 }
 0x2b4   : > { %1090 = vst [vmem:[#allocation3 + $0xc8] sm:$0xf0] %v1086_v10 }
 0x2b6   : > { %v2301_v36 = vpop.permute.xlu0 %874  ;;  %v2303_v11 = vpop.permute.xlu1 %1053 }
 0x2ba   : > { %v2305_v37 = vpop.permute.xlu0 %845  ;;  %v2307_v58 = vpop.permute.xlu1 %1016 }
 0x2be   : > { %v2309_v38 = vpop.permute.xlu0 %808  ;;  %v1000_v39 = vpop.permute.xlu1 %999 }
 0x2bf   : > { %v1004_v40 = vsel %vm862_vm4, %v1000_v39, %v1002_v29 }
 0x2c0   : > { %1008 = vst [vmem:[#allocation3 + $0x38] sm:$0xf0] %v1004_v40 }
 0x2c2   : > { %v2312_v43 = vpop.permute.xlu0 %790  ;;  %v2314_v63 = vpop.permute.xlu1 %971 }
 0x2c6   : > { %v2316_v55 = vpop.permute.xlu0 %760  ;;  %v2318_v45 = vpop.permute.xlu1 %948 }
 0x2c7   : > { %v953_v47 = vsel %vm404_vm10, %v2318_v45, %v951_v7 }
 0x2c8   : > { %957 = vst [vmem:[#allocation3 + $0x70] sm:$0xf0] %v953_v47 }
 0x2ca   : > { %v705_v48 = vpop.permute.xlu0 %704  ;;  %v904_v56 = vpop.permute.xlu1 %903 }
 0x2cb   : > { %v709_v51 = vsel %vm708_vm11, %v703_v17, %v705_v48  ;;  %v710_v52 = vsel %vm708_vm11, %v705_v48, %v707_v41 }
 0x2cc   : > { %713 = vst [vmem:[#allocation3 + $0x10] sm:$0xf] %v709_v51  ;;  %714 = vst [vmem:[#allocation3 + $0x48] sm:$0xf] %v710_v52 }
 0x2ce   : > { %v2322_v61 = vpop.permute.xlu0 %732  ;;  %v850_v8 = vpop.permute.xlu1 %849 }
 0x2d2   : > { %v2324_v57 = vpop.permute.xlu0 %686  ;;  %v2326_v50 = vpop.permute.xlu1 %812 }
 0x2d6   : > { %v1202_v0 = vpop.permute.xlu0 %1201  ;;  %v831_v33 = vpop.permute.xlu1 %830 }
 0x2d7   : > { %v1205_v1 = vsel %vm647_vm6, %v1200_v22, %v1202_v0  ;;  %v1206_v29 = vsel %vm647_vm6, %v1202_v0, %v2260_v3  ;;  %v833_v34 = vsel %vm362_vm14, %v2274_v44, %v831_v33  ;;  %vm2513_vm6 = vcmask 252928  }
 0x2d8   : > { %1209 = vst [vmem:[#allocation3 + $0xc0] sm:$0xf] %v1205_v1  ;;  %1210 = vst [vmem:[#allocation3 + $0x68] sm:$0xf] %v1206_v29 }
 0x2d9   : > { %837 = vst [vmem:[#allocation3 + $0x78] sm:$0xf0] %v833_v34  ;;  %v1225_v34 = vld [vmem:[#allocation3 + $0x70] sm:$0xff] }
 0x2da   : > { %v1175_v4 = vpop.permute.xlu0 %1174  ;;  %v827_v6 = vpop.permute.xlu1 %826 }
 0x2db   : > { %v1180_v62 = vsel %vm674_vm1, %v1175_v4, %v1177_v53  ;;  %v832_v7 = vsel %vm362_vm14, %v827_v6, %v2274_v44  ;;  %vm2505_vm14 = vcmask 277504   ;;  %vm2509_vm1 = vcmask 113664  }
 0x2dc   : > { %1184 = vst [vmem:[#allocation3 + $0x98] sm:$0xf0] %v1180_v62  ;;  %836 = vst [vmem:[#allocation3 + $0x40] sm:$0xf0] %v832_v7 }
 0x2dd   : > { %vm2510_vm2 = vmmov %vm2509_vm1 }
 0x2de   : > { %v1131_v9 = vpop.permute.xlu0 %1130  ;;  %v765_v15 = vpop.permute.xlu1 %764 }
 0x2df   : > { %v1136_v12 = vsel %vm720_vm12, %v1131_v9, %v1133_v5  ;;  %v1237_v3 = vld [vmem:[#allocation3 + $0x68] sm:$0xf]  ;;  %v1236_v13 = vld [vmem:[#allocation3 + $0xc0] sm:$0xf] }
 0x2e0   : > { %1140 = vst [vmem:[#allocation3 + $0xa0] sm:$0xf0] %v1136_v12  ;;  %1439 = vmatprep.subr.msk.mxu1 %vm549_vm0, %v1237_v3 }
 0x2e1   : > { %1440 = vmatpush1.msk.msra.mxu1 %vm549_vm0, %v1236_v13  ;;  %vm2507_vm0 = vmmov %vm2505_vm14 }
 0x2e2   : > { %1262 = vmatprep.subr.mxu1 %v1235_v26  ;;  %v1080_v41 = vpop.permute.xlu0 %1079  ;;  %v661_v44 = vpop.permute.xlu1 %660 }
 0x2e3   : > { %v1085_v42 = vsel %vm778_vm7, %v1080_v41, %v1082_v31  ;;  %v1234_v17 = vld [vmem:[#allocation3 + $0x98] sm:$0xff]  ;;  %vm2514_vm7 = vmmov %vm2513_vm6 }
 0x2e4   : > { %1089 = vst [vmem:[#allocation3 + $0x58] sm:$0xf0] %v1085_v42  ;;  %1263 = vmatpush1.msra.mxu1 %v1234_v17 }
 0x2e6   : > { %v998_v49 = vpop.permute.xlu0 %997  ;;  %v1107_v59 = vpop.permute.xlu1 %1106 }
 0x2e7   : > { %v1003_v18 = vsel %vm862_vm4, %v998_v49, %v1000_v39  ;;  %v1110_v54 = vsel %vm751_vm3, %v2295_v14, %v1107_v59  ;;  %v1111_v21 = vsel %vm751_vm3, %v1107_v59, %v2197_v19  ;;  %vm2511_vm4 = vcmask 146432  }
 0x2e8   : > { %1007 = vst [vmem:[#allocation3 + $0x8] sm:$0xf0] %v1003_v18  ;;  %1114 = vst [vmem:[#allocation3 + $0xa0] sm:$0xf] %v1110_v54  ;;  %vm2515_vm3 = vcmask 269312  }
 0x2e9   : > { %1115 = vst [vmem:[#allocation3 + $0x90] sm:$0xf] %v1111_v21  ;;  %vm2516_vm11 = vmmov %vm2515_vm3 }
 0x2ea   : > { %v902_v22 = vpop.permute.xlu0 %901  ;;  %v1056_v27 = vpop.permute.xlu1 %1055 }
 0x2eb   : > { %v906_v23 = vsel %vm905_vm5, %v2297_v30, %v902_v22  ;;  %v907_v53 = vsel %vm905_vm5, %v902_v22, %v904_v56  ;;  %v1059_v20 = vsel %vm328_vm15, %v2303_v11, %v1056_v27  ;;  %v1060_v60 = vsel %vm328_vm15, %v1056_v27, %v2213_v32  ;;  %vm2512_vm5 = vmmov %vm2511_vm4 }
 0x2ec   : > { %910 = vst [vmem:[#allocation3 + $0x50] sm:$0xf] %v906_v23  ;;  %911 = vst [vmem:[#allocation3 + $0x30] sm:$0xf] %v907_v53  ;;  %vm2506_vm15 = vcmask 7168  }
 0x2ed   : > { %1063 = vst [vmem:[#allocation3 + $0x58] sm:$0xf] %v1059_v20  ;;  %1064 = vst [vmem:[#allocation3 + $0xc8] sm:$0xf] %v1060_v60 }
 0x2ee   : > { %v848_v2 = vpop.permute.xlu0 %847  ;;  %v1019_v35 = vpop.permute.xlu1 %1018 }
 0x2ef   : > { %v851_v19 = vsel %vm392_vm9, %v2305_v37, %v848_v2  ;;  %v852_v5 = vsel %vm392_vm9, %v848_v2, %v850_v8  ;;  %v1022_v14 = vsel %vm377_vm13, %v2307_v58, %v1019_v35  ;;  %v1023_v30 = vsel %vm377_vm13, %v1019_v35, %v2236_v46  ;;  %v1232_v10 = vld [vmem:[#allocation3 + $0xa0] sm:$0xff] }
 0x2f0   : > { %855 = vst [vmem:[#allocation3 + $0x80] sm:$0xf] %v851_v19  ;;  %856 = vst [vmem:[#allocation3 + $0xa8] sm:$0xf] %v852_v5  ;;  %v1233_v31 = vld [vmem:[#allocation3 + $0x90] sm:$0xff]  ;;  %vm2501_vm9 = vcmask 1031168  }
 0x2f1   : > { %1026 = vst [vmem:[#allocation3 + $0x20] sm:$0xf] %v1022_v14  ;;  %1027 = vst [vmem:[#allocation3 + $0xb8] sm:$0xf] %v1023_v30  ;;  %1264 = vmatprep.subr.mxu1 %v1233_v31  ;;  %vm2503_vm13 = vcmask 244736  }
 0x2f2   : > { %v811_v32 = vpop.permute.xlu0 %810  ;;  %1265 = vmatpush1.msra.mxu1 %v1232_v10  ;;  %v974_v39 = vpop.permute.xlu1 %973  ;;  %vm2502_vm12 = vmmov %vm2501_vm9  ;;  %v1211_v19 = vld [vmem:[%s2439_s3] sm:$0xf] }
 0x2f3   : > { %v814_v11 = vsel %vm343_vm8, %v2309_v38, %v811_v32  ;;  %v815_v37 = vsel %vm343_vm8, %v811_v32, %v2326_v50  ;;  %v977_v58 = vsel %vm2501_vm9, %v2314_v63, %v974_v39  ;;  %v978_v46 = vsel %vm2502_vm12, %v974_v39, %v2257_v16  ;;  %vm2504_vm8 = vmmov %vm2503_vm13 }
 0x2f4   : > { %818 = vst [vmem:[#allocation3 + $0x40] sm:$0xf] %v814_v11  ;;  %819 = vst [vmem:[#allocation3 + $0x78] sm:$0xf] %v815_v37  ;;  %v1231_v40 = vld [vmem:[#allocation3 + $0xc8] sm:$0xff]  ;;  %v1230_v47 = vld [vmem:[#allocation3 + $0x58] sm:$0xff] }
 0x2f5   : > { %981 = vst [vmem:[#allocation3 + $0x8] sm:$0xf] %v977_v58  ;;  %982 = vst [vmem:[#allocation3 + $0x38] sm:$0xf] %v978_v46  ;;  %1266 = vmatprep.subr.mxu1 %v1231_v40  ;;  %vm1244_vm9 = vcmask 818176  }
 0x2f6   : > { %v763_v48 = vpop.permute.xlu0 %762  ;;  %1267 = vmatpush1.msra.mxu1 %v1230_v47  ;;  %v947_v52 = vpop.permute.xlu1 %946 }
 0x2f7   : > { %v767_v38 = vsel %vm2503_vm13, %v2316_v55, %v763_v48  ;;  %v768_v51 = vsel %vm2504_vm8, %v763_v48, %v765_v15  ;;  %v952_v63 = vsel %vm404_vm10, %v947_v52, %v2318_v45  ;;  %vm2508_vm10 = vmmov %vm2506_vm15 }
 0x2f8   : > { %771 = vst [vmem:[#allocation3 + $0x60] sm:$0xf] %v767_v38  ;;  %772 = vst [vmem:[#allocation3 + $0x28] sm:$0xf] %v768_v51  ;;  %v1229_v56 = vld [vmem:[#allocation3 + $0xb8] sm:$0xff]  ;;  %v1228_v16 = vld [vmem:[#allocation3 + $0x20] sm:$0xff] }
 0x2f9   : > { %956 = vst [vmem:[#allocation3 + $0x88] sm:$0xf0] %v952_v63  ;;  %1268 = vmatprep.subr.mxu1 %v1229_v56 }
 0x2fa   : > { %v659_v8 = vpop.permute.xlu0 %658  ;;  %1269 = vmatpush1.msra.mxu1 %v1228_v16  ;;  %v925_v0 = vpop.permute.xlu1 %924 }
 0x2fb   : > { %v664_v50 = vsel %vm2505_vm14, %v659_v8, %v661_v44  ;;  %v927_v55 = vsel %vm2506_vm15, %v2292_v28, %v925_v0  ;;  %v1219_v49 = vld [vmem:[#allocation3 + $0x78] sm:$0xff] }
 0x2fc   : > { %668 = vst [vmem:[#allocation3] sm:$0xf] %v664_v50  ;;  %v1227_v1 = vld [vmem:[#allocation3 + $0x38] sm:$0xff]  ;;  %v1226_v29 = vld [vmem:[#allocation3 + $0x8] sm:$0xff]  ;;  %931 = vst [vmem:[#allocation3 + $0x30] sm:$0xf0] %v927_v55 }
 0x2fd   : > { %1270 = vmatprep.subr.mxu1 %v1227_v1 }
 0x2fe   : > { %v657_v33 = vpop.permute.xlu0 %656  ;;  %1271 = vmatpush1.msra.mxu1 %v1226_v29  ;;  %v921_v4 = vpop.permute.xlu1 %920 }
 0x2ff   : > { %v663_v45 = vsel %vm2507_vm0, %v657_v33, %v659_v8  ;;  %1272 = vmatprep.subr.mxu1 %v1225_v34  ;;  %v926_v62 = vsel %vm2508_vm10, %v921_v4, %v2292_v28 }
 0x300   : > { %667 = vst [vmem:[#allocation3 + $0xb0] sm:$0xf] %v663_v45  ;;  %v1224_v6 = vld [vmem:[#allocation3 + $0x88] sm:$0xff]  ;;  %930 = vst [vmem:[#allocation3 + $0x50] sm:$0xf0] %v926_v62 }
 0x301   : > { %1273 = vmatpush1.msra.mxu1 %v1224_v6 }
 0x302   : > { %v877_v7 = vpop.permute.xlu1 %876 }
 0x303   : > { %v880_v9 = vsel %vm2509_vm1, %v2301_v36, %v877_v7  ;;  %v1223_v12 = vld [vmem:[#allocation3 + $0x30] sm:$0xff] }
 0x304   : > { %884 = vst [vmem:[#allocation3 + $0xa8] sm:$0xf0] %v880_v9  ;;  %1274 = vmatprep.subr.mxu1 %v1223_v12 }
 0x306   : > { %v873_v3 = vpop.permute.xlu1 %872 }
 0x307   : > { %v879_v13 = vsel %vm2510_vm2, %v873_v3, %v2301_v36  ;;  %v1222_v15 = vld [vmem:[#allocation3 + $0x50] sm:$0xff]  ;;  %v1218_v36 = vld [vmem:[#allocation3 + $0x40] sm:$0xff] }
 0x308   : > { %883 = vst [vmem:[#allocation3 + $0x80] sm:$0xf0] %v879_v13  ;;  %1275 = vmatpush1.msra.mxu1 %v1222_v15 }
 0x30a   : > { %v793_v26 = vpop.permute.xlu1 %792 }
 0x30b   : > { %v796_v28 = vsel %vm2511_vm4, %v2312_v43, %v793_v26  ;;  %v1221_v41 = vld [vmem:[#allocation3 + $0xa8] sm:$0xff]  ;;  %v1242_v35 = vpop.permute.xlu0 %1241 }
 0x30c   : > { %800 = vst [vmem:[#allocation3 + $0x28] sm:$0xf0] %v796_v28  ;;  %1276 = vmatprep.subr.mxu1 %v1221_v41 }
 0x30e   : > { %v789_v42 = vpop.permute.xlu1 %788 }
 0x30f   : > { %v795_v17 = vsel %vm2512_vm5, %v789_v42, %v2312_v43  ;;  %v1220_v44 = vld [vmem:[#allocation3 + $0x80] sm:$0xff] }
 0x310   : > { %799 = vst [vmem:[#allocation3 + $0x60] sm:$0xf0] %v795_v17  ;;  %1277 = vmatpush1.msra.mxu1 %v1220_v44 }
 0x311   : > { %1278 = vmatprep.subr.mxu1 %v1219_v49 }
 0x312   : > { %v735_v18 = vpop.permute.xlu1 %734  ;;  %1279 = vmatpush1.msra.mxu1 %v1218_v36 }
 0x313   : > { %v738_v59 = vsel %vm2513_vm6, %v2322_v61, %v735_v18  ;;  %v1217_v54 = vld [vmem:[#allocation3 + $0x28] sm:$0xff] }
 0x314   : > { %742 = vst [vmem:[#allocation3 + $0x48] sm:$0xf0] %v738_v59  ;;  %1280 = vmatprep.subr.mxu1 %v1217_v54 }
 0x316   : > { %v731_v21 = vpop.permute.xlu1 %730 }
 0x317   : > { %v737_v22 = vsel %vm2514_vm7, %v731_v21, %v2322_v61  ;;  %v1216_v23 = vld [vmem:[#allocation3 + $0x60] sm:$0xff] }
 0x318   : > { %741 = vst [vmem:[#allocation3 + $0x10] sm:$0xf0] %v737_v22  ;;  %1281 = vmatpush1.msra.mxu1 %v1216_v23 }
 0x31a   : > { %v689_v43 = vpop.permute.xlu1 %688 }
 0x31b   : > { %v692_v53 = vsel %vm2515_vm3, %v2324_v57, %v689_v43  ;;  %v1215_v27 = vld [vmem:[#allocation3 + $0x48] sm:$0xff] }
 0x31c   : > { %696 = vst [vmem:[#allocation3] sm:$0xf0] %v692_v53  ;;  %1282 = vmatprep.subr.mxu1 %v1215_v27 }
 0x31e   : > { %v685_v20 = vpop.permute.xlu1 %684 }
 0x31f   : > { %v691_v60 = vsel %vm2516_vm11, %v685_v20, %v2324_v57  ;;  %v1214_v2 = vld [vmem:[#allocation3 + $0x10] sm:$0xff] }
 0x320   : > { %695 = vst [vmem:[#allocation3 + $0xb0] sm:$0xf0] %v691_v60  ;;  %1283 = vmatpush1.msra.mxu1 %v1214_v2 }
 0x323   : > { %v1213_v61 = vld [vmem:[#allocation3] sm:$0xff] }
 0x324   : > { %1284 = vmatprep.subr.mxu1 %v1213_v61 }
 0x327   : > { %v1212_v5 = vld [vmem:[#allocation3 + $0xb0] sm:$0xff] }
 0x328   : > { %1285 = vmatpush1.msra.mxu1 %v1212_v5 }
 0x329   : > { %1441 = vmatmul.mubr.msk.f32.vlgmr.msra.gmra.mxu1 %vm1244_vm9, %v1211_v19 }
 0x3e9   : > { %v1320_v14 = vpop.f32.mrf.mxu1 }
 0x3ea   : > { %v1321_v30 = vadd.f32 %v1320_v14, %v1242_v35 }
 0x3eb   : > { %v1322_v57 = vpop.f32.mrf.mxu1 }
 0x3ec   : > { %v1325_v31 = vmax.f32 %v1321_v30, 0.0  ;;  %v1323_v10 = vadd.f32 %v1322_v57, %v1242_v35 }
 0x3ee   : > { %v1326_v32 = vmax.f32 %v1323_v10, 0.0  ;;  %v1327_v11 = vadd.f32 %v1325_v31, %v2013_v24 }
 0x3f0   : > { %v1328_v37 = vadd.f32 %v1326_v32, %v2016_v25 }
 0x3f2   : > { %v1331_v39 = vcombine.low %v1327_v11, %v1328_v37 }
 0x3f4   : > { %1333 = vst [vmem:[%s240_s28] sm:$0xff] %v1331_v39 }
 0x3f5   : > { %1574 = shalt.err (!%p1571_p10)
}
 0x3f6   : > { %s1575_s25 = scalar_lea.hbm %s1347_s9, 128  ;;  %s1579_s14 = scalar_lea.hbm %s2441_s5, 256 }
 0x3f7   : > { %p1576_p2 = scmp.ne.s32.totalorder %s1347_s9, %s1575_s25  ;;  %p1580_p7 = scmp.lt.s32.totalorder %s1347_s9, %s2441_s5 }
 0x3f8   : > { %p1581_p0 = scmp.lt.s32.totalorder %s1579_s14, %s1575_s25 }
 0x3f9   : > { %p1577_p4 = pnand %p1576_p2, %p2518_p12 }
 0x3fa   : > { %p1582_p6 = por %p1581_p0, %p1580_p7 }
 0x3fb   : > { %p1578_p9 = pneg %p1577_p4 }
 0x3fd   : > { %p1583_p11 = pnand %p1582_p6, %p1578_p9 }
 0x3ff   : > { %1586 = shalt.err (!%p1583_p11)
}
 0x400   : > { %1451 = dma.vmem_to_hbm [thread:$0]  (%p2518_p12), %s1350_s7, 128, %s1347_s9, %s1335_s16  }
 0x401 PF: > { %s1361_s17 = sand.u32 1, %s1613_s18   ;;  %p2519_p13 = scmp.ne.s32.totalorder %s2481_s6, 0 }
 0x402   : > { %p2520_p1 = scmp.ge.s32.totalorder %s1625_s21, 2  ;;  %s1362_s28 = scalar_lea.sflag [#allocation6], %s1361_s17 }
 0x404   : > { %p1458_p3 = pnand %p2520_p1, %p2519_p13 }
 0x406   : > { %p1459_p5 = pneg %p1458_p3 }
 0x408   : > { %1608 = dma.done.wait (%p1459_p5), %s1362_s28, 128  }
 0x409   : > { %1610 = vsyncadd (%p1459_p5), %s1362_s28, 4294967168  ;;  %p18_p8 = scmp.ge.s32.totalorder %s1710_s24, 4   ;;  %s2521_s18 = smov %s1617_s19 }
 0x40a   : > { %s2522_s19 = smov %s1621_s20  ;;  %s2523_s20 = smov %s1722_s27 }
 0x40b   : > { %s2524_s21 = smov %s1710_s24  ;;  %20 = sbr.rel (!%p18_p8) target bundleno = 5 (0x5), region = 85 }
 0x410   :  { %1367 = vsyncpa [#allocation5], 1 }
 0x411   :  { %1369 = vsyncpa [#allocation5 + $0x1], 1 }
 0x412   :  { %1370 = vsyncpa [#allocation6], 1 }
 0x413   :  { %1372 = vsyncpa [#allocation6 + $0x1], 1 }

</bundles_post_ra>
